<compile_context>
chip_gen: v5e
topology: v5e:2x2
jax: 0.10.0
libtpu: 0.0.40
codegen_flags: <defaults>
</compile_context>

<pallas_src>
import math

import jax
import jax.numpy as jnp
from jax import lax
from jax.experimental import pallas as pl
from jax.experimental.pallas import tpu as pltpu


# ----------------------------------------------------------------------------
# Trace-time weight / bias re-layout (runs once in the wrapper, not in-kernel)
# ----------------------------------------------------------------------------
def _banded_weight(w, Wp, Wo, stride, out_pad):
  """HWIO conv weight (k,k,Ci,Co) -> (k, Wp*Ci, (Wo+2*out_pad)*Co) banded mats.

  G[kh, (stride*wo+kw)*Ci + ci, (wo+out_pad)*Co + co] = w[kh, kw, ci, co],
  zero elsewhere.  A padded input row slab (Ho, Wp*Ci) matmul'd with G[kh]
  gives that kh-tap's contribution to the whole output row, already placed at
  the next layer's side-pad lane offset (exact-zero pad columns).
  """
  k, _, Ci, Co = w.shape
  Wn = Wo + 2 * out_pad
  wo = jnp.arange(Wo)
  mats = []
  for kh in range(k):
    g = jnp.zeros((Wp, Ci, Wn, Co), w.dtype)
    for kw in range(k):
      g = g.at[stride * wo + kw, :, wo + out_pad, :].set(w[kh, kw])
    mats.append(g.reshape(Wp * Ci, Wn * Co))
  return jnp.stack(mats, axis=0)


def _bias_row(b, Wo, out_pad):
  """(Co,) bias -> (1, (Wo+2*out_pad)*Co) row; zero in the side-pad columns."""
  Co = b.shape[0]
  Wn = Wo + 2 * out_pad
  row = jnp.zeros((Wn, Co), b.dtype)
  row = row.at[out_pad:out_pad + Wo, :].set(b)
  return row.reshape(1, Wn * Co)


# ----------------------------------------------------------------------------
# Fused DownBlock kernel (built from static per-layer geometry)
# ----------------------------------------------------------------------------
def _make_downblock_kernel(cfgs):
  n_layers = len(cfgs)

  def kernel(*refs):
    x_ref = refs[0]                                    # (1, 2, Hp0/2, Wp0*Ci0) bf16
    w_refs = [refs[1 + 2 * i] for i in range(n_layers)]  # (k, Wp*Ci, Nout) bf16
    b_refs = [refs[2 + 2 * i] for i in range(n_layers)]  # (1, Nout) f32
    o_ref = refs[1 + 2 * n_layers]                     # (1, Hf, Wf*Cf) f32
    pad_refs = list(refs[2 + 2 * n_layers:])           # bf16 padded-act scratch per layer>=1

    # ---- layer 0: stride-2 conv on the row-parity-split, pre-padded input ----
    c = cfgs[0]
    x0 = x_ref[0]                                      # (2, Hp0/2, Wp0*Ci0)
    acc = None
    for kh in range(c["k"]):
      # padded rows {2*ho + kh} == parity (kh%2), contiguous rows kh//2 ..
      lhs = x0[kh % 2, kh // 2: kh // 2 + c["Ho"], :]  # (Ho, Wp0*Ci0) bf16
      part = jnp.dot(lhs, w_refs[0][kh], preferred_element_type=jnp.float32)
      acc = part if acc is None else acc + part
    y = jnp.maximum(acc + b_refs[0][...], 0.0)         # (Ho0, Nout0) f32

    # ---- layers 1..: stride-1 convs; fused epilogue store into padded scratch --
    for i in range(1, n_layers):
      c = cfgs[i]
      sp = pad_refs[i - 1]                             # (Hp, Wp*Ci) bf16
      p = c["p"]
      # Zero only the top/bottom halo rows.  Side-pad columns are already exact
      # zeros inside `y` (banded matmul + zero bias there).  Done every grid
      # step (cheap: 2*p rows) so each core's scratch is valid under a
      # megacore-split "parallel" batch axis.
      zrow = jnp.zeros((p, c["Wrow"]), sp.dtype)
      sp[0:p, :] = zrow
      sp[c["Hp"] - p: c["Hp"], :] = zrow
      # Fused bias+ReLU+cast store of the previous layer's activation into the
      # interior: full-width, lane-aligned store (no extra store+load pass).
      sp[p: p + c["Hi"], :] = y.astype(sp.dtype)

      acc = None
      for kh in range(c["k"]):
        lhs = sp[kh: kh + c["Ho"], :]                  # (Ho, Wp*Ci) bf16 row slab
        part = jnp.dot(lhs, w_refs[i][kh], preferred_element_type=jnp.float32)
        acc = part if acc is None else acc + part
      y = jnp.maximum(acc + b_refs[i][...], 0.0)       # (Ho, Nout) f32

    # Lane-dense writeback: last dim = Wf*Cf (multiple of 128 here).
    o_ref[0] = y.astype(o_ref.dtype)

  return kernel


# ----------------------------------------------------------------------------
# Wrapper
# ----------------------------------------------------------------------------
def downblock_forward_pallas(x_nhwc, params):
  """x_nhwc: (N, H, W, Cin) f32.  params: list of {'w': (k,k,ci,co) HWIO,
  'b': (co,), 'stride': int} in DownBlock layer order."""
  N, H, W, Cin = x_nhwc.shape
  n_layers = len(params)

  # Static per-layer geometry.
  cfgs = []
  Hi, Wi, Ci = H, W, Cin
  for prm in params:
    k = int(prm["w"].shape[0])
    s = int(prm["stride"])
    p = k // 2
    Co = int(prm["w"].shape[3])
    Ho = (Hi + 2 * p - k) // s + 1
    Wo = (Wi + 2 * p - k) // s + 1
    cfgs.append(dict(k=k, s=s, p=p, Hi=Hi, Wi=Wi, Ci=Ci, Ho=Ho, Wo=Wo, Co=Co,
                     Hp=Hi + 2 * p, Wp=Wi + 2 * p, Wrow=(Wi + 2 * p) * Ci))
    Hi, Wi, Ci = Ho, Wo, Co
  # Each layer's matmul output width already includes the NEXT layer's side pad.
  for li, c in enumerate(cfgs):
    c["out_pad"] = cfgs[li + 1]["p"] if li + 1 < n_layers else 0
    c["Nout"] = (c["Wo"] + 2 * c["out_pad"]) * c["Co"]
  Hf, Wf, Cf = cfgs[-1]["Ho"], cfgs[-1]["Wo"], cfgs[-1]["Co"]

  c0 = cfgs[0]
  assert c0["s"] == 2, "DownBlock's first conv is stride 2"
  assert c0["Hp"] % 2 == 0, "row-parity split needs an even padded height"
  assert (c0["k"] - 1) // 2 + c0["Ho"] <= c0["Hp"] // 2

  # Input prep (one-time, wrapper-side): zero-pad, split padded rows by parity
  # (space-to-depth along H so stride-2 taps are contiguous slices), flatten
  # (W, C) onto the lane axis, single bf16 cast.
  p0 = c0["p"]
  xpad = jnp.pad(x_nhwc, ((0, 0), (p0, p0), (p0, p0), (0, 0)))
  xs2d = (xpad.reshape(N, c0["Hp"] // 2, 2, c0["Wrow"])
              .transpose(0, 2, 1, 3)
              .astype(jnp.bfloat16))                   # (N, 2, Hp0/2, Wp0*Ci0)

  operands = [xs2d]
  in_specs = [pl.BlockSpec((1, 2, c0["Hp"] // 2, c0["Wrow"]),
                           lambda n: (n, 0, 0, 0))]
  for c, prm in zip(cfgs, params):
    g = _banded_weight(prm["w"], c["Wp"], c["Wo"], c["s"], c["out_pad"])
    brow = _bias_row(prm["b"], c["Wo"], c["out_pad"])
    operands += [g.astype(jnp.bfloat16), brow.astype(jnp.float32)]
    in_specs += [pl.BlockSpec(g.shape, lambda n: (0, 0, 0)),
                 pl.BlockSpec(brow.shape, lambda n: (0, 0))]

  # One bf16 padded-activation scratch per layer >= 1 (tiny at these shapes).
  scratch_shapes = [pltpu.VMEM((c["Hp"], c["Wrow"]), jnp.bfloat16)
                    for c in cfgs[1:]]

  out2 = pl.pallas_call(
      _make_downblock_kernel(tuple(cfgs)),
      out_shape=jax.ShapeDtypeStruct((N, Hf, Wf * Cf), jnp.float32),
      grid=(N,),
      in_specs=in_specs,
      out_specs=pl.BlockSpec((1, Hf, Wf * Cf), lambda n: (n, 0, 0)),
      scratch_shapes=scratch_shapes,
      compiler_params=pltpu.CompilerParams(
          dimension_semantics=("parallel",)),  # megacore split on v7x; free elsewhere
  )(*operands)
  return out2.reshape(N, Hf, Wf, Cf)


# ----------------------------------------------------------------------------
# Parameter construction (mirrors DownBlock.__init__ / ConvNormAct defaults)
# ----------------------------------------------------------------------------
def make_downblock_params(key, in_channels, out_channels,
                          mid_channels=None, kernels=(3, 3)):
  if isinstance(kernels, int):
    assert mid_channels is None
    layers = [(in_channels, out_channels, kernels, 2)]
  else:
    if mid_channels is None:
      mid_channels = out_channels
    i_ch = [in_channels] + [mid_channels] * (len(kernels) - 1)
    o_ch = [mid_channels] * (len(kernels) - 1) + [out_channels]
    layers = [(i_ch[0], o_ch[0], kernels[0], 2)]
    for i in range(1, len(kernels)):
      layers.append((i_ch[i], o_ch[i], kernels[i], 1))

  params = []
  for kk, (ci, co, ks, st) in zip(jax.random.split(key, len(layers)), layers):
    kw_key, kb_key = jax.random.split(kk)
    w = jax.random.normal(kw_key, (ks, ks, ci, co), jnp.float32) / math.sqrt(ks * ks * ci)
    b = 0.1 * jax.random.normal(kb_key, (co,), jnp.float32)
    params.append(dict(w=w, b=b, stride=st))
  return params


# ----------------------------------------------------------------------------
# Pure-JAX reference (conv + bias + ReLU, symmetric PyTorch-style padding)
# ----------------------------------------------------------------------------
def downblock_forward_ref(x_nhwc, params):
  y = x_nhwc
  for prm in params:
    k = prm["w"].shape[0]
    p = k // 2
    s = prm["stride"]
    y = lax.conv_general_dilated(
        y, prm["w"], window_strides=(s, s), padding=[(p, p), (p, p)],
        dimension_numbers=("NHWC", "HWIO", "NHWC"))
    y = jnp.maximum(y + prm["b"], 0.0)
  return y


# ----------------------------------------------------------------------------
if __name__ == "__main__":
  key = jax.random.PRNGKey(0)
  k_x, k_p = jax.random.split(key)

  # PyTorch-convention input: NCHW (2, 4, 16, 16)
  x_nchw = jax.random.normal(k_x, (2, 4, 16, 16), jnp.float32)
  x_nhwc = jnp.transpose(x_nchw, (0, 2, 3, 1))

  # DownBlock(4, 32, kernels=[3, 3]): conv3x3 s2 + ReLU -> conv3x3 s1 + ReLU.
  params = make_downblock_params(k_p, in_channels=4, out_channels=32,
                                 kernels=(3, 3))

  out = jax.block_until_ready(downblock_forward_pallas(x_nhwc, params))
  assert out.shape == (2, 8, 8, 32), out.shape
  assert bool(jnp.all(jnp.isfinite(out)))

  ref = jax.block_until_ready(downblock_forward_ref(x_nhwc, params))
  err = float(jnp.max(jnp.abs(out - ref)))
  assert err < 5e-2, f"max abs error vs reference: {err}"  # bf16 matmul operands

  print("KERNEL_OK")
</pallas_src>

<mosaic_0001>
module attributes {stable_mosaic.version = 11 : i64} {
  func.func @kernel(%arg0: i32, %arg1: memref<1x2x9x72xbf16, #tpu.memory_space<vmem>>, %arg2: memref<3x72x320xbf16, #tpu.memory_space<vmem>>, %arg3: memref<1x320xf32, #tpu.memory_space<vmem>>, %arg4: memref<3x320x256xbf16, #tpu.memory_space<vmem>>, %arg5: memref<1x256xf32, #tpu.memory_space<vmem>>, %arg6: memref<1x8x256xf32, #tpu.memory_space<vmem>>, %arg7: memref<10x320xbf16, #tpu.memory_space<vmem>>) attributes {dimension_semantics = [#tpu.dimension_semantics<parallel>], iteration_bounds = array<i64: 2>, scalar_prefetch = 0 : i64, scratch_operands = 1 : i64, tpu.core_type = #tpu.core_type<tc>, window_params = [{transform_indices = @transform_0, window_bounds = array<i64: 1, 2, 9, 72>}, {pipeline_mode = #tpu.pipeline_mode<synchronous>, transform_indices = @transform_1, window_bounds = array<i64: 3, 72, 320>}, {pipeline_mode = #tpu.pipeline_mode<synchronous>, transform_indices = @transform_2, window_bounds = array<i64: 1, 320>}, {pipeline_mode = #tpu.pipeline_mode<synchronous>, transform_indices = @transform_3, window_bounds = array<i64: 3, 320, 256>}, {pipeline_mode = #tpu.pipeline_mode<synchronous>, transform_indices = @transform_4, window_bounds = array<i64: 1, 256>}, {transform_indices = @transform_5, window_bounds = array<i64: 1, 8, 256>}]} {
    %c0 = arith.constant 0 : index
    %c0_0 = arith.constant 0 : index
    %c0_1 = arith.constant 0 : index
    %c0_2 = arith.constant 0 : index
    %0 = vector.load %arg1[%c0, %c0_0, %c0_1, %c0_2] : memref<1x2x9x72xbf16, #tpu.memory_space<vmem>>, vector<1x2x9x72xbf16>
    %1 = vector.shape_cast %0 : vector<1x2x9x72xbf16> to vector<2x9x72xbf16>
    %2 = vector.extract_strided_slice %1 {offsets = [0, 0, 0], sizes = [1, 8, 72], strides = [1, 1, 1]} : vector<2x9x72xbf16> to vector<1x8x72xbf16>
    %3 = vector.shape_cast %2 : vector<1x8x72xbf16> to vector<8x72xbf16>
    %c0_3 = arith.constant 0 : index
    %c0_4 = arith.constant 0 : index
    %c0_5 = arith.constant 0 : index
    %4 = vector.load %arg2[%c0_3, %c0_4, %c0_5] : memref<3x72x320xbf16, #tpu.memory_space<vmem>>, vector<1x72x320xbf16>
    %5 = vector.shape_cast %4 : vector<1x72x320xbf16> to vector<72x320xbf16>
    %cst = arith.constant dense<0.000000e+00> : vector<8x320xf32>
    %6 = tpu.matmul %3, %5, %cst {dimension_numbers = #tpu.dot_dimension_numbers<[1], [0], [0], [1], [0, 0, 1, 1], [], []>} : vector<8x72xbf16>, vector<72x320xbf16>, vector<8x320xf32> -> vector<8x320xf32>
    %7 = vector.extract_strided_slice %1 {offsets = [1, 0, 0], sizes = [1, 8, 72], strides = [1, 1, 1]} : vector<2x9x72xbf16> to vector<1x8x72xbf16>
    %8 = vector.shape_cast %7 : vector<1x8x72xbf16> to vector<8x72xbf16>
    %c1 = arith.constant 1 : index
    %c0_6 = arith.constant 0 : index
    %c0_7 = arith.constant 0 : index
    %9 = vector.load %arg2[%c1, %c0_6, %c0_7] : memref<3x72x320xbf16, #tpu.memory_space<vmem>>, vector<1x72x320xbf16>
    %10 = vector.shape_cast %9 : vector<1x72x320xbf16> to vector<72x320xbf16>
    %cst_8 = arith.constant dense<0.000000e+00> : vector<8x320xf32>
    %11 = tpu.matmul %8, %10, %cst_8 {dimension_numbers = #tpu.dot_dimension_numbers<[1], [0], [0], [1], [0, 0, 1, 1], [], []>} : vector<8x72xbf16>, vector<72x320xbf16>, vector<8x320xf32> -> vector<8x320xf32>
    %12 = arith.addf %6, %11 : vector<8x320xf32>
    %13 = vector.extract_strided_slice %1 {offsets = [0, 1, 0], sizes = [1, 8, 72], strides = [1, 1, 1]} : vector<2x9x72xbf16> to vector<1x8x72xbf16>
    %14 = vector.shape_cast %13 : vector<1x8x72xbf16> to vector<8x72xbf16>
    %c2 = arith.constant 2 : index
    %c0_9 = arith.constant 0 : index
    %c0_10 = arith.constant 0 : index
    %15 = vector.load %arg2[%c2, %c0_9, %c0_10] : memref<3x72x320xbf16, #tpu.memory_space<vmem>>, vector<1x72x320xbf16>
    %16 = vector.shape_cast %15 : vector<1x72x320xbf16> to vector<72x320xbf16>
    %cst_11 = arith.constant dense<0.000000e+00> : vector<8x320xf32>
    %17 = tpu.matmul %14, %16, %cst_11 {dimension_numbers = #tpu.dot_dimension_numbers<[1], [0], [0], [1], [0, 0, 1, 1], [], []>} : vector<8x72xbf16>, vector<72x320xbf16>, vector<8x320xf32> -> vector<8x320xf32>
    %18 = arith.addf %12, %17 : vector<8x320xf32>
    %c0_12 = arith.constant 0 : index
    %c0_13 = arith.constant 0 : index
    %19 = vector.load %arg3[%c0_12, %c0_13] : memref<1x320xf32, #tpu.memory_space<vmem>>, vector<1x320xf32>
    %20 = vector.broadcast %19 : vector<1x320xf32> to vector<8x320xf32>
    %21 = arith.addf %18, %20 : vector<8x320xf32>
    %cst_14 = arith.constant 0.000000e+00 : f32
    %22 = vector.broadcast %cst_14 : f32 to vector<8x320xf32>
    %23 = arith.maximumf %21, %22 : vector<8x320xf32>
    %cst_15 = arith.constant 0.000000e+00 : bf16
    %24 = vector.broadcast %cst_15 : bf16 to vector<1x320xbf16>
    %c0_16 = arith.constant 0 : index
    %c0_17 = arith.constant 0 : index
    %25 = vector.load %arg7[%c0_16, %c0_17] : memref<10x320xbf16, #tpu.memory_space<vmem>>, vector<1x320xbf16>
    tpu.vector_store %arg7[%c0_16, %c0_17], %24 {strides = array<i32>} : memref<10x320xbf16, #tpu.memory_space<vmem>>, vector<1x320xbf16>,
    %c9 = arith.constant 9 : index
    %c0_18 = arith.constant 0 : index
    %26 = vector.load %arg7[%c9, %c0_18] : memref<10x320xbf16, #tpu.memory_space<vmem>>, vector<1x320xbf16>
    tpu.vector_store %arg7[%c9, %c0_18], %24 {strides = array<i32>} : memref<10x320xbf16, #tpu.memory_space<vmem>>, vector<1x320xbf16>,
    %27 = arith.truncf %23 : vector<8x320xf32> to vector<8x320xbf16>
    %c1_19 = arith.constant 1 : index
    %c0_20 = arith.constant 0 : index
    %28 = vector.load %arg7[%c1_19, %c0_20] : memref<10x320xbf16, #tpu.memory_space<vmem>>, vector<8x320xbf16>
    tpu.vector_store %arg7[%c1_19, %c0_20], %27 {strides = array<i32>} : memref<10x320xbf16, #tpu.memory_space<vmem>>, vector<8x320xbf16>,
    %c0_21 = arith.constant 0 : index
    %c0_22 = arith.constant 0 : index
    %29 = vector.load %arg7[%c0_21, %c0_22] : memref<10x320xbf16, #tpu.memory_space<vmem>>, vector<8x320xbf16>
    %c0_23 = arith.constant 0 : index
    %c0_24 = arith.constant 0 : index
    %c0_25 = arith.constant 0 : index
    %30 = vector.load %arg4[%c0_23, %c0_24, %c0_25] : memref<3x320x256xbf16, #tpu.memory_space<vmem>>, vector<1x320x256xbf16>
    %31 = vector.shape_cast %30 : vector<1x320x256xbf16> to vector<320x256xbf16>
    %cst_26 = arith.constant dense<0.000000e+00> : vector<8x256xf32>
    %32 = tpu.matmul %29, %31, %cst_26 {dimension_numbers = #tpu.dot_dimension_numbers<[1], [0], [0], [1], [0, 0, 1, 1], [], []>} : vector<8x320xbf16>, vector<320x256xbf16>, vector<8x256xf32> -> vector<8x256xf32>
    %c1_27 = arith.constant 1 : index
    %c0_28 = arith.constant 0 : index
    %33 = vector.load %arg7[%c1_27, %c0_28] : memref<10x320xbf16, #tpu.memory_space<vmem>>, vector<8x320xbf16>
    %c1_29 = arith.constant 1 : index
    %c0_30 = arith.constant 0 : index
    %c0_31 = arith.constant 0 : index
    %34 = vector.load %arg4[%c1_29, %c0_30, %c0_31] : memref<3x320x256xbf16, #tpu.memory_space<vmem>>, vector<1x320x256xbf16>
    %35 = vector.shape_cast %34 : vector<1x320x256xbf16> to vector<320x256xbf16>
    %cst_32 = arith.constant dense<0.000000e+00> : vector<8x256xf32>
    %36 = tpu.matmul %33, %35, %cst_32 {dimension_numbers = #tpu.dot_dimension_numbers<[1], [0], [0], [1], [0, 0, 1, 1], [], []>} : vector<8x320xbf16>, vector<320x256xbf16>, vector<8x256xf32> -> vector<8x256xf32>
    %37 = arith.addf %32, %36 : vector<8x256xf32>
    %c2_33 = arith.constant 2 : index
    %c0_34 = arith.constant 0 : index
    %38 = vector.load %arg7[%c2_33, %c0_34] : memref<10x320xbf16, #tpu.memory_space<vmem>>, vector<8x320xbf16>
    %c2_35 = arith.constant 2 : index
    %c0_36 = arith.constant 0 : index
    %c0_37 = arith.constant 0 : index
    %39 = vector.load %arg4[%c2_35, %c0_36, %c0_37] : memref<3x320x256xbf16, #tpu.memory_space<vmem>>, vector<1x320x256xbf16>
    %40 = vector.shape_cast %39 : vector<1x320x256xbf16> to vector<320x256xbf16>
    %cst_38 = arith.constant dense<0.000000e+00> : vector<8x256xf32>
    %41 = tpu.matmul %38, %40, %cst_38 {dimension_numbers = #tpu.dot_dimension_numbers<[1], [0], [0], [1], [0, 0, 1, 1], [], []>} : vector<8x320xbf16>, vector<320x256xbf16>, vector<8x256xf32> -> vector<8x256xf32>
    %42 = arith.addf %37, %41 : vector<8x256xf32>
    %c0_39 = arith.constant 0 : index
    %c0_40 = arith.constant 0 : index
    %43 = vector.load %arg5[%c0_39, %c0_40] : memref<1x256xf32, #tpu.memory_space<vmem>>, vector<1x256xf32>
    %44 = vector.broadcast %43 : vector<1x256xf32> to vector<8x256xf32>
    %45 = arith.addf %42, %44 : vector<8x256xf32>
    %cst_41 = arith.constant 0.000000e+00 : f32
    %46 = vector.broadcast %cst_41 : f32 to vector<8x256xf32>
    %47 = arith.maximumf %45, %46 : vector<8x256xf32>
    %c0_42 = arith.constant 0 : index
    %c0_43 = arith.constant 0 : index
    %c0_44 = arith.constant 0 : index
    %48 = vector.load %arg6[%c0_42, %c0_43, %c0_44] : memref<1x8x256xf32, #tpu.memory_space<vmem>>, vector<1x8x256xf32>
    %49 = vector.shape_cast %48 : vector<1x8x256xf32> to vector<8x256xf32>
    %50 = vector.shape_cast %47 : vector<8x256xf32> to vector<1x8x256xf32>
    tpu.vector_store %arg6[%c0_42, %c0_43, %c0_44], %50 {strides = array<i32>} : memref<1x8x256xf32, #tpu.memory_space<vmem>>, vector<1x8x256xf32>,
    return
  }
  func.func @transform_0(%arg0: i32) -> (i32, i32, i32, i32) {
    %c0_i32 = arith.constant 0 : i32
    %c0_i32_0 = arith.constant 0 : i32
    %c0_i32_1 = arith.constant 0 : i32
    %c0_i32_2 = arith.constant 0 : i32
    return %arg0, %c0_i32, %c0_i32_0, %c0_i32_1 : i32, i32, i32, i32
  }
  func.func @transform_1(%arg0: i32) -> (i32, i32, i32) {
    %c0_i32 = arith.constant 0 : i32
    %c0_i32_0 = arith.constant 0 : i32
    %c0_i32_1 = arith.constant 0 : i32
    %c0_i32_2 = arith.constant 0 : i32
    return %c0_i32, %c0_i32_0, %c0_i32_1 : i32, i32, i32
  }
  func.func @transform_2(%arg0: i32) -> (i32, i32) {
    %c0_i32 = arith.constant 0 : i32
    %c0_i32_0 = arith.constant 0 : i32
    %c0_i32_1 = arith.constant 0 : i32
    return %c0_i32, %c0_i32_0 : i32, i32
  }
  func.func @transform_3(%arg0: i32) -> (i32, i32, i32) {
    %c0_i32 = arith.constant 0 : i32
    %c0_i32_0 = arith.constant 0 : i32
    %c0_i32_1 = arith.constant 0 : i32
    %c0_i32_2 = arith.constant 0 : i32
    return %c0_i32, %c0_i32_0, %c0_i32_1 : i32, i32, i32
  }
  func.func @transform_4(%arg0: i32) -> (i32, i32) {
    %c0_i32 = arith.constant 0 : i32
    %c0_i32_0 = arith.constant 0 : i32
    %c0_i32_1 = arith.constant 0 : i32
    return %c0_i32, %c0_i32_0 : i32, i32
  }
  func.func @transform_5(%arg0: i32) -> (i32, i32, i32) {
    %c0_i32 = arith.constant 0 : i32
    %c0_i32_0 = arith.constant 0 : i32
    %c0_i32_1 = arith.constant 0 : i32
    return %arg0, %c0_i32, %c0_i32_0 : i32, i32, i32
  }
}

</mosaic_0001>

<bundles_post_ra>
// kernel: tpu_custom_call.1
= control target key start
LH: loop header
LB: loop body
LE: loop exit
PB: predicated region body
PF: predicated region fallthrough
CT: control target
= control target key end

     0   :  { %10 = vsyncpa [#allocation4], 0  ;;  %s3257_s0 = inlined_call_operand.vmem [shape: bf16[2,2,9,72], index: 0, kind: input, shape index: {}]   ;;  %s3258_s1 = inlined_call_operand.hbm [shape: bf16[3,72,320], index: 1, kind: input, shape index: {}]   ;;  %s3259_s2 = inlined_call_operand.vmem [shape: f32[1,320], index: 2, kind: input, shape index: {}]   ;;  %s3260_s3 = inlined_call_operand.hbm [shape: bf16[3,320,256], index: 3, kind: input, shape index: {}]   ;;  %s3261_s4 = inlined_call_operand.vmem [shape: f32[1,256], index: 4, kind: input, shape index: {}]   ;;  %s3262_s5 = inlined_call_operand.hbm [shape: f32[2,8,256], index: 5, kind: output, shape index: {}]  }
   0x1   :  { %11 = vsyncpa [#allocation7], 0 }
   0x2   :  { %12 = vsyncpa [#allocation5], 0 }
   0x3   :  { %14 = vsyncpa [#allocation5 + $0x1], 0  ;;  %s2973_s18 = smov 0   ;;  %s2975_s19 = smov 0  }
   0x4   :  { %s2977_s20 = smov 0   ;;  %s2979_s21 = smov 0  }
   0x5 LB: > { %s2994_s22 = sadd.s32 4294967295, %s2935_s21   ;;  %s1923_s23 = sadd.s32 4294967294, %s2935_s21   ;;  %s2935_s21 = sphi %s2979_s21, %s3281_s21   ;;  %s2931_s20 = sphi %s2977_s20, %s3280_s20   ;;  %s2927_s19 = sphi %s2975_s19, %s3279_s19   ;;  %s2923_s18 = sphi %s2973_s18, %s3278_s18  }
   0x6   : > { %s2998_s24 = sadd.s32 1, %s2935_s21   ;;  %s137_s25 = sadd.s32 1, %s2931_s20 }
   0x7   : > { %s134_s26 = ssub.s32 %s2935_s21, %s2998_s24  ;;  %p147_p0 = scmp.ne.s32.totalorder %s2931_s20, %s2927_s19 }
   0x8   : > { %p135_p1 = scmp.eq.s32.totalorder %s134_s26, 0  ;;  %p148_p2 = scmp.eq.s32.totalorder %s2994_s22, 1 }
   0x9   : > { %p153_p3 = scmp.ne.s32.totalorder %s2927_s19, %s2923_s18  ;;  %p154_p4 = scmp.eq.s32.totalorder %s1923_s23, 1 }
   0xa   : > { %s3009_s27 = scalar_select %p135_p1, %s2931_s20, %s137_s25  }
   0xb   : > { %p3011_p5 = por %p148_p2, %p147_p0  ;;  %p3015_p6 = por %p154_p4, %p153_p3 }
   0xc   : > { %p1924_p7 = scmp.ge.s32.totalorder %s2935_s21, 1  ;;  %p161_p8 = scmp.lt.s32.totalorder %s2935_s21, 3 }
   0xd   : > { %p2762_p9 = scmp.eq.s32.totalorder %s2994_s22, 0  ;;  %s172_s8 = sshll.u32 %s3258_s1, 4  ;;  %s173_s8 = int_to_ptr.hbm [resolvable:$true] %s172_s8 }
   0xe   : > { %p3022_p10 = pnand %p1924_p7, %p161_p8  ;;  %s2937_s9 = smov [#allocation3]  }
   0xf   : > { %s174_s10 = sshll.u32 %s2937_s9, 4  ;;  %s189_s13 = sshll.u32 %s3260_s3, 4  ;;  %s175_s10 = int_to_ptr.vmem [resolvable:$true] %s174_s10  ;;  %s190_s13 = int_to_ptr.hbm [resolvable:$true] %s189_s13 }
  0x10   : > { %p2751_p11 = pneg %p3022_p10  ;;  %s2938_s14 = smov 192  }
  0x11   : > { %s2939_s15 = smov 12   ;;  %s2940_s16 = smov [#allocation6]  }
  0x12   : > { %p2752_p12 = pnand %p2762_p9, %p2751_p11  ;;  %s191_s17 = sshll.u32 %s2940_s16, 4  ;;  %s192_s17 = int_to_ptr.vmem [resolvable:$true] %s191_s17 }
  0x13   : > { %s2941_s23 = smov 128   ;;  %s2942_s25 = smov 8  }
  0x14   : > { %2754 = dma.hbm_to_vmem [thread:$0]  (!%p2752_p12), %s173_s8, 5184, %s175_s10, [#allocation4], %s2938_s14, %s2938_s14, %s2939_s15  }
  0x15   : > { %2757 = dma.hbm_to_vmem [thread:$0]  (!%p2752_p12), %s190_s13, 15360, %s192_s17, [#allocation7], %s2941_s23, %s2941_s23, %s2942_s25  }
  0x16   : > { %218 = sbr.rel (%p3022_p10) target bundleno = 480 (0x1e0), region = 40 }
  0x1b   : > { %2910 = dma.done.wait (%p2762_p9), [#allocation4], 5184  }
  0x1c   : > { %2912 = vsyncadd (%p2762_p9), [#allocation4], 4294962112 }
  0x1d   : > { %2914 = dma.done.wait (%p2762_p9), [#allocation7], 15360  }
  0x1e   : > { %2916 = vsyncadd (%p2762_p9), [#allocation7], 4294951936  ;;  %v296_v0 = vld [vmem:[#allocation3 + $0xcc] sm:$0xff]  ;;  %v297_v1 = vld [vmem:[#allocation3 + $0xd4] sm:$0xf]  ;;  %vm374_vm0 = vcmask 1043456  }
  0x1f   : > { %v277_v2 = vld [vmem:[#allocation3 + $0x60] sm:$0xff]  ;;  %v340_v3 = vunpack.c.l.b16 %v296_v0  ;;  %v342_v4 = vunpack.c.l.b16 %v297_v1  ;;  %v341_v6 = vunpack.c.h.b16 %v296_v0  ;;  %v1972_v7 = vld [vmem:[#allocation3 + $0xb4] sm:$0xf]  ;;  %v1980_v12 = vld [vmem:[#allocation3 + $0xbc] sm:$0xf]  ;;  %p252_p13 = scmp.lt.s32.totalorder %s2994_s22, 1 }
  0x20   : > { %v465_v5 = vunpack.c.l.b16 %v277_v2  ;;  %v2606_v11 = vld [vmem:[#allocation3 + $0xbc] sm:$0xf0]  ;;  %v2607_v13 = vld [vmem:[#allocation3 + $0xc4] sm:$0xf0]  ;;  %v2594_v15 = vld [vmem:[#allocation3 + $0x50] sm:$0xf0]  ;;  %v466_v36 = vunpack.c.h.b16 %v277_v2 }
  0x21   : > { %v355_v8 = vpack.c.b16 %v340_v3, %v340_v3  ;;  %v357_v9 = vpack.c.b16 %v342_v4, %v342_v4  ;;  %v2023_v14 = vld [vmem:[#allocation3 + $0x48] sm:$0xf]  ;;  %v356_v16 = vpack.c.b16 %v341_v6, %v341_v6  ;;  %v1960_v20 = vld [vmem:[#allocation3 + $0x9c] sm:$0xf]  ;;  %v2605_v21 = vld [vmem:[#allocation3 + $0xb8] sm:$0xf]  ;;  %v1973_v22 = vor.u32 %v2606_v11, %v1972_v7 }
  0x22   : > { %v480_v10 = vpack.c.b16 %v465_v5, %v465_v5  ;;  %v1981_v23 = vor.u32 %v2607_v13, %v1980_v12  ;;  %v2603_v25 = vld [vmem:[#allocation3 + $0xa4] sm:$0xf0]  ;;  %v1974_v26 = vld [vmem:[#allocation3 + $0xc0] sm:$0xf0]  ;;  %v2024_v27 = vor.u32 %v2594_v15, %v2023_v14  ;;  %v2604_v29 = vld [vmem:[#allocation3 + $0xac] sm:$0xf0]  ;;  %v481_v50 = vpack.c.b16 %v466_v36, %v466_v36 }
  0x23   : > { %v376_v17 = vsel %vm374_vm0, %v355_v8, 0  ;;  %v382_v18 = vsel %vm374_vm0, %v357_v9, 0  ;;  %v379_v24 = vsel %vm374_vm0, %v356_v16, 0  ;;  %v1968_v28 = vld [vmem:[#allocation3 + $0xa4] sm:$0xf]  ;;  %v1977_v30 = vor.u32 %v2605_v21, %v1974_v26  ;;  %v563_v31 = vld [vmem:[#allocation3 + $0x138] sm:$0xff] }
  0x24   : > { %v499_v19 = vsel %vm374_vm0, %v480_v10, 0  ;;  %387 = vmatpush.bf16.msra.mxu0 %v376_v17  ;;  %413 = vmatpush.bf16.msra.mxu2 %v382_v18  ;;  %v2011_v32 = vld [vmem:[#allocation3 + $0x30] sm:$0xf]  ;;  %v2591_v33 = vld [vmem:[#allocation3 + $0x38] sm:$0xf0]  ;;  %v1961_v37 = vor.u32 %v2603_v25, %v1960_v20  ;;  %v1969_v38 = vor.u32 %v2604_v29, %v1968_v28  ;;  %v619_v40 = vunpack.c.l.b16 %v563_v31  ;;  %s3054_s26 = scalar_select %p252_p13, %s2994_s22, 1 }
  0x25   : > { %510 = vmatpush.bf16.msra.mxu3 %v499_v19  ;;  %400 = vmatpush.bf16.msra.mxu1 %v379_v24  ;;  %v2602_v34 = vld [vmem:[#allocation3 + $0xa0] sm:$0xf]  ;;  %v1962_v35 = vld [vmem:[#allocation3 + $0xa8] sm:$0xf0]  ;;  %v1948_v39 = vld [vmem:[#allocation3 + $0x84] sm:$0xf]  ;;  %v2012_v41 = vor.u32 %v2591_v33, %v2011_v32  ;;  %v620_v46 = vunpack.c.h.b16 %v563_v31 }
  0x26   : > { %v2600_v42 = vld [vmem:[#allocation3 + $0x8c] sm:$0xf0]  ;;  %v1956_v43 = vld [vmem:[#allocation3 + $0x8c] sm:$0xf]  ;;  %v2601_v44 = vld [vmem:[#allocation3 + $0x94] sm:$0xf0]  ;;  %v1965_v45 = vor.u32 %v2602_v34, %v1962_v35  ;;  %v634_v55 = vpack.c.b16 %v619_v40, %v619_v40 }
  0x27   : > { %v1999_v47 = vld [vmem:[#allocation3 + $0x18] sm:$0xf]  ;;  %v2588_v48 = vld [vmem:[#allocation3 + $0x20] sm:$0xf0]  ;;  %v2599_v49 = vld [vmem:[#allocation3 + $0x88] sm:$0xf]  ;;  %v1949_v52 = vor.u32 %v2600_v42, %v1948_v39  ;;  %v1957_v53 = vor.u32 %v2601_v44, %v1956_v43  ;;  %v635_v60 = vpack.c.b16 %v620_v46, %v620_v46 }
  0x28   : > { %388 = vmatpush.bf16.msra.mxu0 %v1973_v22  ;;  %414 = vmatpush.bf16.msra.mxu2 %v1981_v23  ;;  %v1950_v51 = vld [vmem:[#allocation3 + $0x90] sm:$0xf0]  ;;  %v1936_v54 = vld [vmem:[#allocation3 + $0x6c] sm:$0xf]  ;;  %s2582_s30 = sshll.u32 %s3054_s26, 4  ;;  %v2000_v56 = vor.u32 %v2588_v48, %v1999_v47  ;;  %v502_v4 = vsel %vm374_vm0, %v481_v50, 0 }
  0x29   : > { %511 = vmatpush.bf16.msra.mxu3 %v2024_v27  ;;  %401 = vmatpush.bf16.msra.mxu1 %v1977_v30  ;;  %v2597_v57 = vld [vmem:[#allocation3 + $0x74] sm:$0xf0]  ;;  %v1944_v58 = vld [vmem:[#allocation3 + $0x74] sm:$0xf]  ;;  %v2598_v59 = vld [vmem:[#allocation3 + $0x7c] sm:$0xf0]  ;;  %v1953_v61 = vor.u32 %v2599_v49, %v1950_v51  ;;  %s256_s8 = scalar_lea.vmem %s3257_s0, %s2582_s30 }
  0x2a   : > { %v1987_v62 = vld [vmem:[#allocation3] sm:$0xf]  ;;  %v2585_v63 = vld [vmem:[#allocation3 + $0x8] sm:$0xf0]  ;;  %v278_v0 = vld [vmem:[#allocation3 + $0x68] sm:$0xf]  ;;  %v1937_v2 = vor.u32 %v2597_v57, %v1936_v54  ;;  %v1945_v3 = vor.u32 %v2598_v59, %v1944_v58 }
  0x2b   : > { %v467_v1 = vunpack.c.l.b16 %v278_v0  ;;  %vm370_vm1 = vcmask 588800   ;;  %v1988_v5 = vor.u32 %v2585_v63, %v1987_v62  ;;  %v653_v6 = vsel %vm374_vm0, %v634_v55, 0  ;;  %v2596_v8 = vld [vmem:[#allocation3 + $0x70] sm:$0xf]  ;;  %v1938_v9 = vld [vmem:[#allocation3 + $0x78] sm:$0xf0] }
  0x2c   : > { %389 = vmatpush.bf16.msra.mxu0 %v1961_v37  ;;  %415 = vmatpush.bf16.msra.mxu2 %v1969_v38  ;;  %v656_v7 = vsel %vm374_vm0, %v635_v60, 0  ;;  %v2593_v10 = vld [vmem:[#allocation3 + $0x4c] sm:$0xf]  ;;  %v2025_v11 = vld [vmem:[#allocation3 + $0x54] sm:$0xf0]  ;;  %v1941_v21 = vor.u32 %v2596_v8, %v1938_v9  ;;  %vm717_vm2 = vcmask 1040384  }
  0x2d   : > { %512 = vmatpush.bf16.msra.mxu3 %v2012_v41  ;;  %402 = vmatpush.bf16.msra.mxu1 %v1965_v45  ;;  %v2078_v12 = vld [vmem:[#allocation3 + $0x120] sm:$0xf]  ;;  %v482_v13 = vpack.c.b16 %v467_v1, %v467_v1  ;;  %v2618_v14 = vld [vmem:[#allocation3 + $0x128] sm:$0xf0]  ;;  %v2617_v15 = vld [vmem:[#allocation3 + $0x124] sm:$0xf]  ;;  %v2028_v22 = vor.u32 %v2593_v10, %v2025_v11 }
  0x2e   : > { %v2080_v16 = vld [vmem:[#allocation3 + $0x12c] sm:$0xf0]  ;;  %v2038_v17 = vld [vmem:[%s256_s8] sm:$0xf]  ;;  %v2583_v18 = vld [vmem:[%s256_s8] sm:$0x10]  ;;  %v2079_v26 = vor.u32 %v2618_v14, %v2078_v12 }
  0x2f   : > { %v260_v19 = vld [vmem:[%s256_s8 + $0x8] sm:$0xf]  ;;  %v3063_v20 = vld [vmem:[%s256_s8] sm:$0xf]  ;;  %v2590_v23 = vld [vmem:[#allocation3 + $0x34] sm:$0xf]  ;;  %v2083_v27 = vor.u32 %v2617_v15, %v2080_v16  ;;  %v2039_v34 = vor.u32 %v2583_v18, %v2038_v17 }
  0x30   : > { %390 = vmatpush.bf16.msra.mxu0 %v1949_v52  ;;  %416 = vmatpush.bf16.msra.mxu2 %v1957_v53  ;;  %v2013_v24 = vld [vmem:[#allocation3 + $0x3c] sm:$0xf0]  ;;  %v2066_v25 = vld [vmem:[#allocation3 + $0x108] sm:$0xf]  ;;  %v505_v28 = vsel %vm374_vm0, %v482_v13, 0  ;;  %vm720_vm4 = vcmask 1044484  }
  0x31   : > { %513 = vmatpush.bf16.msra.mxu3 %v2000_v56  ;;  %403 = vmatpush.bf16.msra.mxu1 %v1953_v61  ;;  %v2031_v29 = vld [vmem:[#allocation3 + $0x50] sm:$0xf]  ;;  %v2595_v30 = vld [vmem:[#allocation3 + $0x58] sm:$0xf0]  ;;  %v2615_v31 = vld [vmem:[#allocation3 + $0x110] sm:$0xf0]  ;;  %v2016_v35 = vor.u32 %v2590_v23, %v2013_v24 }
  0x32   : > { %v2614_v32 = vld [vmem:[#allocation3 + $0x10c] sm:$0xf]  ;;  %v2068_v33 = vld [vmem:[#allocation3 + $0x114] sm:$0xf0]  ;;  %v2032_v36 = vor.u32 %v2595_v30, %v2031_v29  ;;  %v2587_v37 = vld [vmem:[#allocation3 + $0x1c] sm:$0xf]  ;;  %v2067_v40 = vor.u32 %v2615_v31, %v2066_v25 }
  0x33   : > { %v2001_v38 = vld [vmem:[#allocation3 + $0x24] sm:$0xf0]  ;;  %v564_v39 = vld [vmem:[#allocation3 + $0x140] sm:$0xf]  ;;  %v2071_v41 = vor.u32 %v2614_v32, %v2068_v33  ;;  %v2054_v42 = vld [vmem:[#allocation3 + $0xf0] sm:$0xf] }
  0x34   : > { %391 = vmatpush.bf16.msra.mxu0 %v1937_v2  ;;  %417 = vmatpush.bf16.msra.mxu2 %v1945_v3  ;;  %v2019_v43 = vld [vmem:[#allocation3 + $0x38] sm:$0xf]  ;;  %v2592_v44 = vld [vmem:[#allocation3 + $0x40] sm:$0xf0]  ;;  %v2612_v45 = vld [vmem:[#allocation3 + $0xf8] sm:$0xf0]  ;;  %v621_v48 = vunpack.c.l.b16 %v564_v39  ;;  %v2004_v49 = vor.u32 %v2587_v37, %v2001_v38 }
  0x35   : > { %514 = vmatpush.bf16.msra.mxu3 %v1988_v5  ;;  %404 = vmatpush.bf16.msra.mxu1 %v1941_v21  ;;  %v2611_v46 = vld [vmem:[#allocation3 + $0xf4] sm:$0xf]  ;;  %v2056_v47 = vld [vmem:[#allocation3 + $0xfc] sm:$0xf0]  ;;  %v2020_v50 = vor.u32 %v2592_v44, %v2019_v43  ;;  %v2584_v51 = vld [vmem:[#allocation3 + $0x4] sm:$0xf]  ;;  %v2055_v54 = vor.u32 %v2612_v45, %v2054_v42 }
  0x36   : > { %v1989_v52 = vld [vmem:[#allocation3 + $0xc] sm:$0xf0]  ;;  %v573_v53 = vshll.u32 %v2039_v34, 16  ;;  %v2059_v55 = vor.u32 %v2611_v46, %v2056_v47  ;;  %v2042_v56 = vld [vmem:[#allocation3 + $0xd8] sm:$0xf]  ;;  %v636_v62 = vpack.c.b16 %v621_v48, %v621_v48  ;;  %v571_v3 = vshrl.u32 %v2039_v34, 16 }
  0x37   : > { %1982 = vmatmul.msk.bf16.vlgmr.msra.gmra.mxu0 %vm370_vm1, %v260_v19  ;;  %1984 = vmatmul.msk.bf16.vlgmr.msra.gmra.mxu2 %vm370_vm1, %v260_v19  ;;  %v2007_v57 = vld [vmem:[#allocation3 + $0x20] sm:$0xf]  ;;  %v2589_v58 = vld [vmem:[#allocation3 + $0x28] sm:$0xf0]  ;;  %v2609_v59 = vld [vmem:[#allocation3 + $0xe0] sm:$0xf0]  ;;  %v1992_v1 = vor.u32 %v2584_v51, %v1989_v52 }
  0x38   : > { %523 = vmatpush.bf16.msrb.mxu0 %v502_v4  ;;  %664 = vmatpush.bf16.msrb.mxu2 %v653_v6  ;;  %v2608_v60 = vld [vmem:[#allocation3 + $0xdc] sm:$0xf]  ;;  %v2044_v61 = vld [vmem:[#allocation3 + $0xe4] sm:$0xf0]  ;;  %v2213_v63 = vld [vmem:[#allocation6 + $0x230] sm:$0xf]  ;;  %v2008_v2 = vor.u32 %v2589_v58, %v2007_v57  ;;  %v2043_v5 = vor.u32 %v2609_v59, %v2042_v56 }
  0x39   : > { %677 = vmatpush.bf16.msrb.mxu3 %v656_v7  ;;  %536 = vmatpush.bf16.msrb.mxu1 %v505_v28  ;;  %v2691_v0 = vld [vmem:[#allocation6 + $0x234] sm:$0xf0]  ;;  %v575_v4 = vrot.slane %v573_v53, 1  ;;  %v2047_v6 = vor.u32 %v2608_v60, %v2044_v61  ;;  %v1995_v7 = vld [vmem:[#allocation3 + $0x8] sm:$0xf]  ;;  %v659_v10 = vsel %vm374_vm0, %v636_v62, 0 }
  0x3a   : > { %2033 = vmatmul.msk.bf16.vlgmr.msra.gmra.mxu3 %vm370_vm1, %v3063_v20  ;;  %1983 = vmatmul.msk.bf16.vlgmr.msra.gmra.mxu1 %vm370_vm1, %v260_v19  ;;  %v2586_v8 = vld [vmem:[#allocation3 + $0x10] sm:$0xf0]  ;;  %v2214_v9 = vor.u32 %v2691_v0, %v2213_v63  ;;  %v2086_v11 = vld [vmem:[#allocation3 + $0x128] sm:$0xf]  ;;  %v2074_v16 = vld [vmem:[#allocation3 + $0x110] sm:$0xf] }
  0x3b   : > { %v2619_v12 = vld [vmem:[#allocation3 + $0x130] sm:$0xf0]  ;;  %v576_v13 = vor.u32 %v575_v4, %v571_v3  ;;  %v1996_v14 = vor.u32 %v2586_v8, %v1995_v7  ;;  %v2616_v17 = vld [vmem:[#allocation3 + $0x118] sm:$0xf0]  ;;  %v2062_v19 = vld [vmem:[#allocation3 + $0xf8] sm:$0xf] }
  0x3c   : > { %524 = vmatpush.bf16.msrb.mxu0 %v2028_v22  ;;  %665 = vmatpush.bf16.msrb.mxu2 %v2079_v26  ;;  %v2087_v15 = vor.u32 %v2619_v12, %v2086_v11  ;;  %v2075_v18 = vor.u32 %v2616_v17, %v2074_v16  ;;  %v2613_v21 = vld [vmem:[#allocation3 + $0x100] sm:$0xf0]  ;;  %v2050_v23 = vld [vmem:[#allocation3 + $0xe0] sm:$0xf]  ;;  %v2610_v24 = vld [vmem:[#allocation3 + $0xe8] sm:$0xf0] }
  0x3d   : > { %678 = vmatpush.bf16.msrb.mxu3 %v2083_v27  ;;  %537 = vmatpush.bf16.msrb.mxu1 %v2032_v36  ;;  %v2063_v22 = vor.u32 %v2613_v21, %v2062_v19  ;;  %v2051_v25 = vor.u32 %v2610_v24, %v2050_v23  ;;  %v2690_v26 = vld [vmem:[#allocation6 + $0x234] sm:$0xf]  ;;  %v2215_v27 = vld [vmem:[#allocation6 + $0x238] sm:$0xf0]  ;;  %v2205_v29 = vld [vmem:[#allocation6 + $0x220] sm:$0xf] }
  0x3e   : > { %v2218_v28 = vor.u32 %v2690_v26, %v2215_v27  ;;  %v2689_v30 = vld [vmem:[#allocation6 + $0x224] sm:$0xf0]  ;;  %v2688_v31 = vld [vmem:[#allocation6 + $0x224] sm:$0xf]  ;;  %v2207_v33 = vld [vmem:[#allocation6 + $0x228] sm:$0xf0] }
  0x3f   : > { %v2206_v32 = vor.u32 %v2689_v30, %v2205_v29  ;;  %v2210_v34 = vor.u32 %v2688_v31, %v2207_v33  ;;  %v2686_v37 = vld [vmem:[#allocation6 + $0x214] sm:$0xf]  ;;  %v2199_v38 = vld [vmem:[#allocation6 + $0x218] sm:$0xf0]  ;;  %v2684_v42 = vld [vmem:[#allocation6 + $0x204] sm:$0xf] }
  0x40   : > { %525 = vmatpush.bf16.msrb.mxu0 %v2016_v35  ;;  %666 = vmatpush.bf16.msrb.mxu2 %v2067_v40  ;;  %v2687_v35 = vld [vmem:[#allocation6 + $0x214] sm:$0xf0]  ;;  %v2202_v39 = vor.u32 %v2686_v37, %v2199_v38  ;;  %v2189_v40 = vld [vmem:[#allocation6 + $0x200] sm:$0xf]  ;;  %v2191_v44 = vld [vmem:[#allocation6 + $0x208] sm:$0xf0] }
  0x41   : > { %679 = vmatpush.bf16.msrb.mxu3 %v2071_v41  ;;  %538 = vmatpush.bf16.msrb.mxu1 %v2020_v50  ;;  %v2685_v41 = vld [vmem:[#allocation6 + $0x204] sm:$0xf0]  ;;  %v2194_v45 = vor.u32 %v2684_v42, %v2191_v44  ;;  %v2149_v46 = vld [vmem:[#allocation6 + $0x1b0] sm:$0xf]  ;;  %v2675_v47 = vld [vmem:[#allocation6 + $0x1b4] sm:$0xf0] }
  0x42   : > { %v2190_v43 = vor.u32 %v2685_v41, %v2189_v40  ;;  %v2181_v48 = vld [vmem:[#allocation6 + $0x1f0] sm:$0xf]  ;;  %v2683_v50 = vld [vmem:[#allocation6 + $0x1f4] sm:$0xf0]  ;;  %v2682_v51 = vld [vmem:[#allocation6 + $0x1f4] sm:$0xf] }
  0x43   : > { %v2183_v52 = vld [vmem:[#allocation6 + $0x1f8] sm:$0xf0]  ;;  %v2182_v53 = vor.u32 %v2683_v50, %v2181_v48  ;;  %v2673_v56 = vld [vmem:[#allocation6 + $0x1a4] sm:$0xf0]  ;;  %v2173_v57 = vld [vmem:[#allocation6 + $0x1e0] sm:$0xf] }
  0x44   : > { %526 = vmatpush.bf16.msrb.mxu0 %v2004_v49  ;;  %667 = vmatpush.bf16.msrb.mxu2 %v2055_v54  ;;  %v2150_v49 = vor.u32 %v2675_v47, %v2149_v46  ;;  %v2186_v54 = vor.u32 %v2682_v51, %v2183_v52  ;;  %v2681_v59 = vld [vmem:[#allocation6 + $0x1e4] sm:$0xf0]  ;;  %v2680_v60 = vld [vmem:[#allocation6 + $0x1e4] sm:$0xf]  ;;  %v2175_v61 = vld [vmem:[#allocation6 + $0x1e8] sm:$0xf0] }
  0x45   : > { %680 = vmatpush.bf16.msrb.mxu3 %v2059_v55  ;;  %539 = vmatpush.bf16.msrb.mxu1 %v2008_v2  ;;  %v2141_v55 = vld [vmem:[#allocation6 + $0x1a0] sm:$0xf]  ;;  %v2174_v62 = vor.u32 %v2681_v59, %v2173_v57  ;;  %v2178_v63 = vor.u32 %v2680_v60, %v2175_v61  ;;  %v2133_v0 = vld [vmem:[#allocation6 + $0x190] sm:$0xf]  ;;  %v2679_v4 = vld [vmem:[#allocation6 + $0x1d4] sm:$0xf0] }
  0x46   : > { %v2142_v58 = vor.u32 %v2673_v56, %v2141_v55  ;;  %v2165_v2 = vld [vmem:[#allocation6 + $0x1d0] sm:$0xf]  ;;  %v2157_v11 = vld [vmem:[#allocation6 + $0x1c0] sm:$0xf]  ;;  %vm718_vm3 = vsmask.f32 256 }
  0x47   : > { %v2166_v7 = vor.u32 %v2679_v4, %v2165_v2  ;;  %vm721_vm5 = vsmask.f32 4352  ;;  %vm3081_vm6 = vmand %vm717_vm2, %vm718_vm3  ;;  %vm732_vm7 = vsmask.f32 7938  ;;  %v724_v16 = vld [vmem:[#allocation2] sm:$0x11] }
  0x48   : > { %527 = vmatpush.bf16.msrb.mxu0 %v1992_v1  ;;  %668 = vmatpush.bf16.msrb.mxu2 %v2043_v5  ;;  %v2671_v1 = vld [vmem:[#allocation6 + $0x194] sm:$0xf0]  ;;  %v2678_v5 = vld [vmem:[#allocation6 + $0x1d4] sm:$0xf]  ;;  %vm3086_vm8 = vmand %vm720_vm4, %vm721_vm5  ;;  %vm734_vm9 = vsmask.f32 7954 }
  0x49   : > { %681 = vmatpush.bf16.msrb.mxu3 %v2047_v6  ;;  %540 = vmatpush.bf16.msrb.mxu1 %v1996_v14  ;;  %v2134_v3 = vor.u32 %v2671_v1, %v2133_v0  ;;  %v2167_v6 = vld [vmem:[#allocation6 + $0x1d8] sm:$0xf0]  ;;  %v2677_v14 = vld [vmem:[#allocation6 + $0x1c4] sm:$0xf0]  ;;  %v737_v17 = vld [vmem:[#allocation2 + $0xc] sm:$0x11] }
  0x4a   : > { %v2170_v8 = vor.u32 %v2678_v5, %v2167_v6  ;;  %vm723_vm10 = vmor %vm3086_vm8, %vm3081_vm6  ;;  %v2676_v19 = vld [vmem:[#allocation6 + $0x1c4] sm:$0xf]  ;;  %v2159_v21 = vld [vmem:[#allocation6 + $0x1c8] sm:$0xf0]  ;;  %vm727_vm14 = vcmask 516096   ;;  %vm774_vm5 = vcmask 519168  }
  0x4b   : > { %2034 = vmatmul.msk.bf16.vlgmr.msrb.gmra.mxu0 %vm370_vm1, %v3063_v20  ;;  %2088 = vmatmul.msk.bf16.vlgmr.msrb.gmra.mxu2 %vm370_vm1, %v576_v13  ;;  %vm3101_vm11 = vmand %vm717_vm2, %vm732_vm7  ;;  %v2162_v24 = vor.u32 %v2676_v19, %v2159_v21  ;;  %v2635_v26 = vld [vmem:[#allocation6 + $0x74] sm:$0xf0]  ;;  %v2634_v29 = vld [vmem:[#allocation6 + $0x74] sm:$0xf]  ;;  %vm768_vm2 = vcmask 1047556   ;;  %s249_s13 = sand.u32 1, %s2927_s19  }
  0x4c   : > { %690 = vmatpush.bf16.msra.mxu0 %v659_v10  ;;  %1123 = vmatpush.bf16.msra.mxu2 %v2214_v9  ;;  %v2125_v9 = vld [vmem:[#allocation6 + $0x180] sm:$0xf]  ;;  %v2669_v10 = vld [vmem:[#allocation6 + $0x184] sm:$0xf0]  ;;  %vm735_vm12 = vmand %vm720_vm4, %vm734_vm9  ;;  %s1931_s14 = sshll.u32 %s249_s13, 4  ;;  %s2740_s16 = sshll.u32 %s2994_s22, 4 }
  0x4d   : > { %2089 = vmatmul.msk.bf16.vlgmr.msrb.gmra.mxu3 %vm370_vm1, %v576_v13  ;;  %2035 = vmatmul.msk.bf16.vlgmr.msrb.gmra.mxu1 %vm370_vm1, %v3063_v20  ;;  %v2197_v20 = vld [vmem:[#allocation6 + $0x210] sm:$0xf]  ;;  %v2313_v30 = vld [vmem:[#allocation6 + $0x78] sm:$0xf0]  ;;  %vm736_vm13 = vmor %vm735_vm12, %vm3101_vm11  ;;  %s251_s15 = scalar_lea.vmem [#allocation8], %s1931_s14  ;;  %s1837_s25 = scalar_lea.hbm %s3262_s5, %s2740_s16 }
  0x4e   : > { %v2198_v36 = vor.u32 %v2687_v35, %v2197_v20  ;;  %1110 = vmatpush.bf16.msra.mxu1 %v2150_v49  ;;  %v2316_v31 = vor.u32 %v2634_v29, %v2313_v30  ;;  %v2667_v33 = vld [vmem:[#allocation6 + $0x174] sm:$0xf0]  ;;  %v2303_v35 = vld [vmem:[#allocation6 + $0x60] sm:$0xf]  ;;  %v2245_v38 = vld [vmem:[#allocation6 + $0x270] sm:$0xf] }
  0x4f   : > { %v2632_v42 = vld [vmem:[#allocation6 + $0x64] sm:$0xf]  ;;  %v2665_v46 = vld [vmem:[#allocation6 + $0x164] sm:$0xf0]  ;;  %v2295_v49 = vld [vmem:[#allocation6 + $0x50] sm:$0xf] }
  0x50   : > { %691 = vmatpush.bf16.msra.mxu0 %v2087_v15  ;;  %1124 = vmatpush.bf16.msra.mxu2 %v2206_v32  ;;  %v2117_v32 = vld [vmem:[#allocation6 + $0x170] sm:$0xf]  ;;  %v2631_v50 = vld [vmem:[#allocation6 + $0x54] sm:$0xf0]  ;;  %v2697_v55 = vld [vmem:[#allocation6 + $0x264] sm:$0xf0] }
  0x51   : > { %v2118_v20 = vor.u32 %v2667_v33, %v2117_v32  ;;  %v2296_v52 = vor.u32 %v2631_v50, %v2295_v49  ;;  %v2630_v56 = vld [vmem:[#allocation6 + $0x54] sm:$0xf]  ;;  %vm3118_vm15 = vmand %vm727_vm14, %vm718_vm3  ;;  %v741_v59 = vld [vmem:[#allocation2 + $0x14] sm:$0x1]  ;;  %s1839_s26 = sshll.u32 %s251_s15, 4  ;;  %s1841_s30 = sshll.u32 %s1837_s25, 4  ;;  %s1840_s26 = int_to_ptr.vmem [resolvable:$true] %s1839_s26  ;;  %s1842_s30 = int_to_ptr.hbm [resolvable:$true] %s1841_s30 }
  0x52   : > { %1111 = vmatpush.bf16.msra.mxu1 %v2142_v58  ;;  %v729_v58 = vld [vmem:[#allocation2 + $0x8] sm:$0x1]  ;;  %v2101_v1 = vld [vmem:[#allocation6 + $0x150] sm:$0xf]  ;;  %v2287_v4 = vld [vmem:[#allocation6 + $0x40] sm:$0xf] }
  0x53   : > { %v730_v61 = vsel %vm3118_vm15, 0, %v729_v58  ;;  %v2629_v6 = vld [vmem:[#allocation6 + $0x44] sm:$0xf0]  ;;  %v2698_v21 = vld [vmem:[#allocation6 + $0x274] sm:$0xf]  ;;  %vm3139_vm3 = vmand %vm374_vm0, %vm732_vm7  ;;  %s1826_s22 = scalar_lea.sflag [#allocation5], %s249_s13 }
  0x54   : > { %692 = vmatpush.bf16.msra.mxu0 %v2075_v18  ;;  %1125 = vmatpush.bf16.msra.mxu2 %v2198_v36  ;;  %v2158_v18 = vor.u32 %v2677_v14, %v2157_v11  ;;  %v2633_v36 = vld [vmem:[#allocation6 + $0x64] sm:$0xf0]  ;;  %731 = vst [vmem:[#allocation2 + $0x8] sm:$0x1] %v730_v61  ;;  %v2289_v14 = vld [vmem:[#allocation6 + $0x48] sm:$0xf0]  ;;  %vm3144_vm4 = vmand %vm768_vm2, %vm734_vm9 }
  0x55   : > { %v2304_v37 = vor.u32 %v2633_v36, %v2303_v35  ;;  %v2661_v19 = vld [vmem:[#allocation6 + $0x144] sm:$0xf0]  ;;  %v3128_v23 = vld [vmem:[%s3259_s2] sm:$0x7]  ;;  %v2273_v49 = vld [vmem:[#allocation6 + $0x28] sm:$0xf0] }
  0x56   : > { %1112 = vmatpush.bf16.msra.mxu1 %v2134_v3  ;;  %v2663_v3 = vld [vmem:[#allocation6 + $0x154] sm:$0xf0]  ;;  %v2693_v32 = vld [vmem:[#allocation6 + $0x244] sm:$0xf0]  ;;  %v705_v35 = vperm.slane %v3128_v23, 0  ;;  %v706_v36 = vperm.slane %v3128_v23, 1  ;;  %vm770_vm0 = vmor %vm3144_vm4, %vm3139_vm3 }
  0x57   : > { %v2102_v5 = vor.u32 %v2663_v3, %v2101_v1  ;;  %v2231_v61 = vld [vmem:[#allocation6 + $0x258] sm:$0xf0]  ;;  %vm775_vm6 = vmand %vm774_vm5, %vm732_vm7  ;;  %s2879_s6 = sshra.s32 %s1842_s30, 4  ;;  %s2885_s10 = scalar_lea.hbm %s3262_s5, 32  ;;  %s2880_s6 = int_to_ptr.hbm [resolvable:$true] %s2879_s6 }
  0x58   : > { %693 = vmatpush.bf16.msra.mxu0 %v2063_v22  ;;  %1126 = vmatpush.bf16.msra.mxu2 %v2190_v43  ;;  %v725_v22 = vsel %vm723_vm10, 0, %v724_v16  ;;  %v2305_v43 = vld [vmem:[#allocation6 + $0x68] sm:$0xf0]  ;;  %v2093_v16 = vld [vmem:[#allocation6 + $0x140] sm:$0xf]  ;;  %s2881_s7 = scalar_lea.hbm %s2880_s6, 16  ;;  %p2886_p3 = scmp.lt.s32.totalorder %s2880_s6, %s3262_s5 }
  0x59   : > { %726 = vst [vmem:[#allocation2] sm:$0x11] %v725_v22  ;;  %v2308_v44 = vor.u32 %v2632_v42, %v2305_v43  ;;  %v2247_v22 = vld [vmem:[#allocation6 + $0x278] sm:$0xf0]  ;;  %v2696_v42 = vld [vmem:[#allocation6 + $0x264] sm:$0xf]  ;;  %p2882_p0 = scmp.ne.s32.totalorder %s2880_s6, %s2881_s7  ;;  %p2887_p4 = scmp.lt.s32.totalorder %s2885_s10, %s2881_s7 }
  0x5a   : > { %v2239_v43 = vld [vmem:[#allocation6 + $0x268] sm:$0xf0]  ;;  %v2539_v57 = vld [vmem:[#allocation6 + $0x378] sm:$0xf0] }
  0x5b   : > { %v776_v12 = vld [vmem:[#allocation2 + $0x8] sm:$0xf]  ;;  %p2883_p1 = pnand %p2882_p0, %p3011_p5  ;;  %p2888_p7 = por %p2887_p4, %p2886_p3 }
  0x5c   : > { %694 = vmatpush.bf16.msra.mxu0 %v2051_v25  ;;  %1127 = vmatpush.bf16.msra.mxu2 %v2182_v53  ;;  %v2311_v25 = vld [vmem:[#allocation6 + $0x70] sm:$0xf]  ;;  %v2237_v53 = vld [vmem:[#allocation6 + $0x260] sm:$0xf] }
  0x5d   : > { %v2238_v60 = vor.u32 %v2697_v55, %v2237_v53  ;;  %v2143_v55 = vld [vmem:[#allocation6 + $0x1a8] sm:$0xf0]  ;;  %p2884_p2 = pneg %p2883_p1 }
  0x5f   : > { %2090 = vmatmul.msk.bf16.vlgmr.msra.gmra.mxu0 %vm370_vm1, %v576_v13  ;;  %v2126_v13 = vor.u32 %v2669_v10, %v2125_v9  ;;  %vm740_vm1 = vmand %vm727_vm14, %vm732_vm7  ;;  %v2288_v10 = vor.u32 %v2629_v6, %v2287_v4  ;;  %v2622_v4 = vld [vmem:[#allocation6 + $0x14] sm:$0xf]  ;;  %vm1106_vm7 = vcmask 523264   ;;  %p2889_p8 = pnand %p2888_p7, %p2884_p2 }
  0x60   : > { %1162 = vmatpush.bf16.msrb.mxu0 %v2218_v28  ;;  %1128 = vmatpush.bf16.msra.mxu2 %v2174_v62  ;;  %v2312_v28 = vor.u32 %v2635_v26, %v2311_v25  ;;  %v2297_v62 = vld [vmem:[#allocation6 + $0x58] sm:$0xf0]  ;;  %v2250_v25 = vor.u32 %v2698_v21, %v2247_v22  ;;  %v2279_v26 = vld [vmem:[#allocation6 + $0x30] sm:$0xf]  ;;  %v2670_v6 = vld [vmem:[#allocation6 + $0x194] sm:$0xf] }
  0x61   : > { %1113 = vmatpush.bf16.msra.mxu1 %v2126_v13  ;;  %v2300_v0 = vor.u32 %v2630_v56, %v2297_v62  ;;  %v2628_v13 = vld [vmem:[#allocation6 + $0x44] sm:$0xf]  ;;  %v2694_v56 = vld [vmem:[#allocation6 + $0x254] sm:$0xf]  ;;  %v2263_v62 = vld [vmem:[#allocation6 + $0x10] sm:$0xf] }
  0x64   : > { %1163 = vmatpush.bf16.msrb.mxu0 %v2210_v34  ;;  %1129 = vmatpush.bf16.msra.mxu2 %v2166_v7  ;;  %v738_v34 = vsel %vm736_vm13, 0, %v737_v17  ;;  %v2229_v7 = vld [vmem:[#allocation6 + $0x250] sm:$0xf] }
  0x65   : > { %739 = vst [vmem:[#allocation2 + $0xc] sm:$0x11] %v738_v34  ;;  %1114 = vmatpush.bf16.msra.mxu1 %v2118_v20  ;;  %v2626_v34 = vld [vmem:[#allocation6 + $0x34] sm:$0xf]  ;;  %v2281_v20 = vld [vmem:[#allocation6 + $0x38] sm:$0xf0] }
  0x68   : > { %1164 = vmatpush.bf16.msrb.mxu0 %v2202_v39  ;;  %1130 = vmatpush.bf16.msra.mxu2 %v2158_v18  ;;  %v2699_v39 = vld [vmem:[#allocation6 + $0x274] sm:$0xf0]  ;;  %v2292_v18 = vor.u32 %v2628_v13, %v2289_v14  ;;  %v2255_v13 = vld [vmem:[#allocation6] sm:$0xf]  ;;  %v2621_v14 = vld [vmem:[#allocation6 + $0x4] sm:$0xf0] }
  0x69   : > { %v2246_v41 = vor.u32 %v2699_v39, %v2245_v38  ;;  %v2674_v38 = vld [vmem:[#allocation6 + $0x1b4] sm:$0xf]  ;;  %v2151_v39 = vld [vmem:[#allocation6 + $0x1b8] sm:$0xf0]  ;;  %v2256_v22 = vor.u32 %v2621_v14, %v2255_v13 }
  0x6b   : > { %1140 = vmatpush.bf16.msra.mxu3 %v2246_v41  ;;  %v2154_v41 = vor.u32 %v2674_v38, %v2151_v39  ;;  %v2728_v38 = vld [vmem:[#allocation6 + $0x364] sm:$0xf] }
  0x6c   : > { %1165 = vmatpush.bf16.msrb.mxu0 %v2194_v45  ;;  %1396 = vmatpush.bf16.msrb.mxu2 %v2312_v28  ;;  %v2109_v45 = vld [vmem:[#allocation6 + $0x160] sm:$0xf]  ;;  %v2627_v28 = vld [vmem:[#allocation6 + $0x34] sm:$0xf0] }
  0x6d   : > { %v2110_v48 = vor.u32 %v2665_v46, %v2109_v45  ;;  %v2280_v30 = vor.u32 %v2627_v28, %v2279_v26  ;;  %v2242_v45 = vor.u32 %v2696_v42, %v2239_v43  ;;  %v2625_v46 = vld [vmem:[#allocation6 + $0x24] sm:$0xf0] }
  0x6f   : > { %1115 = vmatpush.bf16.msra.mxu1 %v2110_v48  ;;  %1141 = vmatpush.bf16.msra.mxu3 %v2238_v60  ;;  %v2624_v48 = vld [vmem:[#allocation6 + $0x24] sm:$0xf] }
  0x70   : > { %1166 = vmatpush.bf16.msrb.mxu0 %v2186_v54  ;;  %1397 = vmatpush.bf16.msrb.mxu2 %v2304_v37  ;;  %v2284_v37 = vor.u32 %v2626_v34, %v2281_v20  ;;  %v2276_v53 = vor.u32 %v2624_v48, %v2273_v49  ;;  %v2111_v48 = vld [vmem:[#allocation6 + $0x168] sm:$0xf0]  ;;  %v771_v49 = vld [vmem:[#allocation2] sm:$0xff] }
  0x73   : > { %1116 = vmatpush.bf16.msra.mxu1 %v2102_v5  ;;  %v2265_v5 = vld [vmem:[#allocation6 + $0x18] sm:$0xf0] }
  0x74   : > { %1167 = vmatpush.bf16.msrb.mxu0 %v2178_v63  ;;  %1398 = vmatpush.bf16.msrb.mxu2 %v2296_v52  ;;  %v742_v63 = vsel %vm740_vm1, 0, %v741_v59 }
  0x75   : > { %743 = vst [vmem:[#allocation2 + $0x14] sm:$0x1] %v742_v63  ;;  %v2623_v63 = vld [vmem:[#allocation6 + $0x14] sm:$0xf0] }
  0x76   : > { %v2264_v3 = vor.u32 %v2623_v63, %v2263_v62 }
  0x78   : > { %1168 = vmatpush.bf16.msrb.mxu0 %v2170_v8  ;;  %v2695_v8 = vld [vmem:[#allocation6 + $0x254] sm:$0xf0]  ;;  %1399 = vmatpush.bf16.msrb.mxu2 %v2288_v10  ;;  %v2223_v10 = vld [vmem:[#allocation6 + $0x248] sm:$0xf0] }
  0x79   : > { %v2230_v11 = vor.u32 %v2695_v8, %v2229_v7 }
  0x7b   : > { %1142 = vmatpush.bf16.msra.mxu3 %v2230_v11 }
  0x7c   : > { %1169 = vmatpush.bf16.msrb.mxu0 %v2162_v24  ;;  %v2094_v24 = vor.u32 %v2661_v19, %v2093_v16  ;;  %1400 = vmatpush.bf16.msrb.mxu2 %v2280_v30  ;;  %v2257_v19 = vld [vmem:[#allocation6 + $0x8] sm:$0xf0] }
  0x7e   : > { %1117 = vmatpush.bf16.msra.mxu1 %v2094_v24  ;;  %v2668_v24 = vld [vmem:[#allocation6 + $0x184] sm:$0xf] }
  0x80   : > { %1435 = vmatpush.bf16.msra.mxu0 %v2316_v31  ;;  %v2221_v31 = vld [vmem:[#allocation6 + $0x240] sm:$0xf] }
  0x81   : > { %v2222_v33 = vor.u32 %v2693_v32, %v2221_v31 }
  0x82   : > { %1179 = vmatpush.bf16.msrb.mxu1 %v2250_v25 }
  0x83   : > { %1143 = vmatpush.bf16.msra.mxu3 %v2222_v33  ;;  %v2666_v33 = vld [vmem:[#allocation6 + $0x174] sm:$0xf] }
  0x84   : > { %1436 = vmatpush.bf16.msra.mxu0 %v2308_v44  ;;  %v2271_v44 = vld [vmem:[#allocation6 + $0x20] sm:$0xf] }
  0x85   : > { %v2272_v52 = vor.u32 %v2625_v46, %v2271_v44  ;;  %v2664_v46 = vld [vmem:[#allocation6 + $0x164] sm:$0xf] }
  0x86   : > { %1180 = vmatpush.bf16.msrb.mxu1 %v2242_v45 }
  0x87   : > { %1149 = vmatpush.bf16.msrb.mxu3 %v2154_v41  ;;  %1401 = vmatpush.bf16.msrb.mxu2 %v2272_v52  ;;  %v707_v41 = vperm.slane %v3128_v23, 2  ;;  %v779_v52 = vld [vmem:[#allocation2 + $0xc] sm:$0x11]  ;;  %v2114_v23 = vor.u32 %v2664_v46, %v2111_v48 }
  0x88   : > { %1437 = vmatpush.bf16.msra.mxu0 %v2300_v0 }
  0x8b   : > { %1402 = vmatpush.bf16.msrb.mxu2 %v2264_v3 }
  0x8c   : > { %1438 = vmatpush.bf16.msra.mxu0 %v2292_v18  ;;  %v2620_v18 = vld [vmem:[#allocation6 + $0x4] sm:$0xf] }
  0x8d   : > { %v2260_v28 = vor.u32 %v2620_v18, %v2257_v19  ;;  %v2651_v19 = vld [vmem:[#allocation6 + $0xf4] sm:$0xf0] }
  0x8f   : > { %1403 = vmatpush.bf16.msrb.mxu2 %v2256_v22  ;;  %v2377_v22 = vld [vmem:[#allocation6 + $0xf8] sm:$0xf0] }
  0x90   : > { %1439 = vmatpush.bf16.msra.mxu0 %v2284_v37 }
  0x94   : > { %1440 = vmatpush.bf16.msra.mxu0 %v2276_v53 }
  0xb4   : > { %v3105_v27 = vpop.f32.mrf.mxu0 }
  0xb7   : > { %v3111_v40 = vpop.f32.mrf.mxu1 }
  0xba   : > { %v3113_v47 = vpop.f32.mrf.mxu2 }
  0xbc   : > { %v395_v54 = vpop.f32.mrf.mxu0 }
  0xbd   : > { %v3115_v51 = vpop.f32.mrf.mxu3  ;;  %v2672_v54 = vld [vmem:[#allocation6 + $0x1a4] sm:$0xf] }
  0xbe   : > { %v517_v58 = vadd.f32 %v3115_v51, %v3105_v27  ;;  %v2146_v60 = vor.u32 %v2672_v54, %v2143_v55  ;;  %v2268_v27 = vor.u32 %v2622_v4, %v2265_v5  ;;  %v2135_v51 = vld [vmem:[#allocation6 + $0x198] sm:$0xf0]  ;;  %v782_v5 = vld [vmem:[#allocation2 + $0x14] sm:$0x1] }
  0xbf   : > { %v408_v2 = vpop.f32.mrf.mxu1  ;;  %v2138_v11 = vor.u32 %v2670_v6, %v2135_v51 }
  0xc0   : > { %v2234_v2 = vor.u32 %v2694_v56, %v2231_v61  ;;  %1150 = vmatpush.bf16.msrb.mxu3 %v2146_v60  ;;  %1441 = vmatpush.bf16.msra.mxu0 %v2268_v27 }
  0xc2   : > { %v421_v9 = vpop.f32.mrf.mxu2  ;;  %1181 = vmatpush.bf16.msrb.mxu1 %v2234_v2 }
  0xc4   : > { %1151 = vmatpush.bf16.msrb.mxu3 %v2138_v11  ;;  %1442 = vmatpush.bf16.msra.mxu0 %v2260_v28 }
  0xc5   : > { %v518_v17 = vpop.f32.mrf.mxu3 }
  0xc8   : > { %v529_v29 = vpop.f32.mrf.mxu0 }
  0xc9   : > { %v530_v59 = vadd.f32 %v529_v29, %v3111_v40  ;;  %v2692_v40 = vld [vmem:[#allocation6 + $0x244] sm:$0xf]  ;;  %v2127_v29 = vld [vmem:[#allocation6 + $0x188] sm:$0xf0] }
  0xca   : > { %v3132_v50 = vpop.f32.mrf.mxu1  ;;  %v2226_v21 = vor.u32 %v2692_v40, %v2223_v10  ;;  %v2130_v31 = vor.u32 %v2668_v24, %v2127_v29  ;;  %v2730_v24 = vld [vmem:[#allocation6 + $0x374] sm:$0xf] }
  0xcb   : > { %v543_v39 = vadd.f32 %v3132_v50, %v3113_v47 }
  0xcc   : > { %1182 = vmatpush.bf16.msrb.mxu1 %v2226_v21  ;;  %1152 = vmatpush.bf16.msrb.mxu3 %v2130_v31  ;;  %v2650_v21 = vld [vmem:[#allocation6 + $0xf4] sm:$0xf]  ;;  %v2367_v31 = vld [vmem:[#allocation6 + $0xe0] sm:$0xf] }
  0xcd   : > { %v2380_v34 = vor.u32 %v2650_v21, %v2377_v22  ;;  %v2657_v21 = vld [vmem:[#allocation6 + $0x124] sm:$0xf0] }
  0xce   : > { %v670_v0 = vpop.f32.mrf.mxu2 }
  0xcf   : > { %v700_v7 = vadd.f32 %v670_v0, %v517_v58  ;;  %v2662_v58 = vld [vmem:[#allocation6 + $0x154] sm:$0xf]  ;;  %v2660_v0 = vld [vmem:[#allocation6 + $0x144] sm:$0xf] }
  0xd0   : > { %v683_v1 = vpop.f32.mrf.mxu3  ;;  %v531_v9 = vpop.f32.mrf.mxu0 }
  0xd1   : > { %v701_v8 = vadd.f32 %v683_v1, %v530_v59  ;;  %v711_v16 = vadd.f32 %v705_v35, %v700_v7  ;;  %v2103_v59 = vld [vmem:[#allocation6 + $0x158] sm:$0xf0]  ;;  %v2095_v1 = vld [vmem:[#allocation6 + $0x148] sm:$0xf0] }
  0xd2   : > { %v544_v30 = vpop.f32.mrf.mxu1  ;;  %v2106_v62 = vor.u32 %v2662_v58, %v2103_v59  ;;  %v2098_v15 = vor.u32 %v2660_v0, %v2095_v1  ;;  %v2407_v59 = vld [vmem:[#allocation6 + $0x130] sm:$0xf]  ;;  %v2644_v0 = vld [vmem:[#allocation6 + $0xc4] sm:$0xf]  ;;  %v2353_v1 = vld [vmem:[#allocation6 + $0xc8] sm:$0xf0] }
  0xd3   : > { %v712_v17 = vadd.f32 %v706_v36, %v701_v8  ;;  %v714_v25 = vmax.f32 %v711_v16, 0.0  ;;  %v2119_v36 = vld [vmem:[#allocation6 + $0x178] sm:$0xf0]  ;;  %v2375_v16 = vld [vmem:[#allocation6 + $0xf0] sm:$0xf] }
  0xd4   : > { %v2122_v42 = vor.u32 %v2666_v33, %v2119_v36  ;;  %v2376_v30 = vor.u32 %v2651_v19, %v2375_v16  ;;  %v2648_v36 = vld [vmem:[#allocation6 + $0xe4] sm:$0xf]  ;;  %v2345_v16 = vld [vmem:[#allocation6 + $0xb8] sm:$0xf0]  ;;  %v2399_v19 = vld [vmem:[#allocation6 + $0x120] sm:$0xf] }
  0xd5   : > { %v715_v26 = vmax.f32 %v712_v17, 0.0 }
  0xd6   : > { %v672_v20 = vpop.f32.mrf.mxu2  ;;  %1153 = vmatpush.bf16.msrb.mxu3 %v2122_v42 }
  0xd7   : > { %v744_v32 = vpack.c.bf16 %v715_v26, %v714_v25  ;;  %v2542_v20 = vor.u32 %v2730_v24, %v2539_v57 }
  0xd8   : > { %v685_v35 = vpop.f32.mrf.mxu3 }
  0xd9   : > { %v747_v37 = vshrl.u32 %v744_v32, 16  ;;  %v750_v44 = vshll.u32 %v744_v32, 16  ;;  %v2649_v35 = vld [vmem:[#allocation6 + $0xe4] sm:$0xf0] }
  0xda   : > { %1154 = vmatpush.bf16.msrb.mxu3 %v2114_v23 }
  0xdb   : > { %v749_v43 = vrot.slane %v747_v37, 7  ;;  %v2369_v37 = vld [vmem:[#allocation6 + $0xe8] sm:$0xf0] }
  0xdc   : > { %v696_v45 = vpop.f32.mrf.mxu0  ;;  %v2372_v46 = vor.u32 %v2648_v36, %v2369_v37 }
  0xdd   : > { %v702_v53 = vadd.f32 %v696_v45, %v543_v39  ;;  %v752_v54 = vor.u32 %v750_v44, %v749_v43  ;;  %v760_v55 = vrot.slane %v749_v43, 4  ;;  %v2531_v39 = vld [vmem:[#allocation6 + $0x368] sm:$0xf0]  ;;  %v2368_v44 = vor.u32 %v2649_v35, %v2367_v31  ;;  %v2720_v31 = vld [vmem:[#allocation6 + $0x324] sm:$0xf] }
  0xde   : > { %1155 = vmatpush.bf16.msrb.mxu3 %v2106_v62  ;;  %v2534_v48 = vor.u32 %v2728_v38, %v2531_v39  ;;  %v2655_v35 = vld [vmem:[#allocation6 + $0x114] sm:$0xf0]  ;;  %v2327_v38 = vld [vmem:[#allocation6 + $0x90] sm:$0xf] }
  0xdf   : > { %v713_v47 = vadd.f32 %v707_v41, %v702_v53  ;;  %v772_v50 = vsel %vm770_vm0, %v752_v54, %v771_v49  ;;  %v780_v56 = vsel %vm723_vm10, %v760_v55, %v779_v52  ;;  %v2359_v49 = vld [vmem:[#allocation6 + $0xd0] sm:$0xf]  ;;  %v2647_v52 = vld [vmem:[#allocation6 + $0xd4] sm:$0xf0]  ;;  %v2646_v53 = vld [vmem:[#allocation6 + $0xd4] sm:$0xf] }
  0xe0   : > { %773 = vst [vmem:[#allocation2] sm:$0xff] %v772_v50  ;;  %v3163_v9 = vunpack.c.l.b16 %v772_v50  ;;  %v3166_v51 = vunpack.c.h.b16 %v772_v50  ;;  %v2361_v54 = vld [vmem:[#allocation6 + $0xd8] sm:$0xf0]  ;;  %v2726_v55 = vld [vmem:[#allocation6 + $0x354] sm:$0xf] }
  0xe1   : > { %v716_v60 = vmax.f32 %v713_v47, 0.0  ;;  %781 = vst [vmem:[#allocation2 + $0xc] sm:$0x11] %v780_v56  ;;  %v2523_v47 = vld [vmem:[#allocation6 + $0x358] sm:$0xf0]  ;;  %v2360_v56 = vor.u32 %v2647_v52, %v2359_v49 }
  0xe2   : > { %1156 = vmatpush.bf16.msrb.mxu3 %v2098_v15  ;;  %v2351_v50 = vld [vmem:[#allocation6 + $0xc0] sm:$0xf]  ;;  %v2526_v62 = vor.u32 %v2726_v55, %v2523_v47  ;;  %v2515_v15 = vld [vmem:[#allocation6 + $0x348] sm:$0xf0]  ;;  %v1188_v24 = vpack.c.b16 %v3163_v9, %v3163_v9  ;;  %v2639_v39 = vld [vmem:[#allocation6 + $0x94] sm:$0xf0] }
  0xe3   : > { %v745_v61 = vpack.c.bf16 %v716_v60, %v716_v60  ;;  %v2659_v60 = vld [vmem:[#allocation6 + $0x134] sm:$0xf0]  ;;  %v2319_v52 = vld [vmem:[#allocation6 + $0x80] sm:$0xf]  ;;  %v2328_v55 = vor.u32 %v2639_v39, %v2327_v38  ;;  %v2636_v47 = vld [vmem:[#allocation6 + $0x84] sm:$0xf] }
  0xe4   : > { %v698_v63 = vpop.f32.mrf.mxu0  ;;  %v2451_v38 = vld [vmem:[#allocation6 + $0x2c8] sm:$0xf0] }
  0xe5   : > { %v754_v2 = vshrl.u32 %v745_v61, 16  ;;  %v757_v4 = vshll.u32 %v745_v61, 16  ;;  %v2364_v61 = vor.u32 %v2646_v53, %v2361_v54  ;;  %v2645_v63 = vld [vmem:[#allocation6 + $0xc4] sm:$0xf0] }
  0xe6   : > { %v2637_v53 = vld [vmem:[#allocation6 + $0x84] sm:$0xf0] }
  0xe7   : > { %v756_v3 = vrot.slane %v754_v2, 7  ;;  %v3192_v54 = vld [vmem:[#allocation2] sm:$0xee] }
  0xe8   : > { %v3161_v8 = vld [vmem:[#allocation2 + $0xc] sm:$0x11] }
  0xe9   : > { %v759_v6 = vor.u32 %v757_v4, %v756_v3  ;;  %v761_v7 = vrot.slane %v756_v3, 4  ;;  %v877_v27 = vunpack.c.l.b16 %v3161_v8  ;;  %v878_v40 = vunpack.c.h.b16 %v3161_v8  ;;  %v2724_v4 = vld [vmem:[#allocation6 + $0x344] sm:$0xf]  ;;  %v2719_v8 = vld [vmem:[#allocation6 + $0x314] sm:$0xf0] }
  0xeb   : > { %v777_v10 = vsel %vm775_vm6, %v759_v6, %v776_v12  ;;  %v783_v11 = vsel %vm3118_vm15, %v761_v7, %v782_v5  ;;  %v880_v13 = vpack.c.b16 %v877_v27, %v3163_v9  ;;  %v881_v14 = vpack.c.b16 %v878_v40, %v3166_v51 }
  0xec   : > { %778 = vst [vmem:[#allocation2 + $0x8] sm:$0xf] %v777_v10  ;;  %v2408_v12 = vor.u32 %v2659_v60, %v2407_v59  ;;  %v2352_v6 = vor.u32 %v2645_v63, %v2351_v50  ;;  %v2356_v7 = vor.u32 %v2644_v0, %v2353_v1  ;;  %v2518_v10 = vor.u32 %v2724_v4, %v2515_v15  ;;  %v2653_v50 = vld [vmem:[#allocation6 + $0x104] sm:$0xf0]  ;;  %v2321_v59 = vld [vmem:[#allocation6 + $0x88] sm:$0xf0] }
  0xed   : > { %784 = vst [vmem:[#allocation2 + $0x14] sm:$0x1] %v783_v11  ;;  %v886_v17 = vshll.u32 %v880_v13, 16  ;;  %v893_v18 = vshll.u32 %v881_v14, 16  ;;  %v884_v25 = vshrl.u32 %v880_v13, 16  ;;  %v891_v28 = vshrl.u32 %v881_v14, 16 }
  0xee   : > { %v2343_v11 = vld [vmem:[#allocation6 + $0xb0] sm:$0xf]  ;;  %v2643_v13 = vld [vmem:[#allocation6 + $0xb4] sm:$0xf0]  ;;  %v2642_v14 = vld [vmem:[#allocation6 + $0xb4] sm:$0xf]  ;;  %v1520_v15 = vunpack.c.h.b16 %v3192_v54 }
  0xef   : > { %v888_v26 = vrot.slane %v886_v17, 1  ;;  %v895_v29 = vrot.slane %v893_v18, 1  ;;  %v2722_v17 = vld [vmem:[#allocation6 + $0x334] sm:$0xf]  ;;  %v2507_v18 = vld [vmem:[#allocation6 + $0x338] sm:$0xf0]  ;;  %v2344_v22 = vor.u32 %v2643_v13, %v2343_v11  ;;  %v2348_v57 = vor.u32 %v2642_v14, %v2345_v16 }
  0xf0   : > { %v2658_v60 = vld [vmem:[#allocation6 + $0x134] sm:$0xf]  ;;  %v2715_v63 = vld [vmem:[#allocation6 + $0x2f4] sm:$0xf0]  ;;  %v2475_v1 = vld [vmem:[#allocation6 + $0x2f8] sm:$0xf0] }
  0xf1   : > { %v3177_v32 = vor.u32 %v888_v26, %v884_v25  ;;  %v896_v33 = vor.u32 %v895_v29, %v891_v28  ;;  %v2510_v25 = vor.u32 %v2722_v17, %v2507_v18  ;;  %v2335_v26 = vld [vmem:[#allocation6 + $0xa0] sm:$0xf]  ;;  %v2641_v28 = vld [vmem:[#allocation6 + $0xa4] sm:$0xf0]  ;;  %v2640_v29 = vld [vmem:[#allocation6 + $0xa4] sm:$0xf]  ;;  %v3198_v18 = vpack.c.b16 %v878_v40, %v1520_v15 }
  0xf2   : > { %v2336_v36 = vor.u32 %v2641_v28, %v2335_v26  ;;  %v2714_v0 = vld [vmem:[#allocation6 + $0x2f4] sm:$0xf]  ;;  %v2401_v11 = vld [vmem:[#allocation6 + $0x128] sm:$0xf0]  ;;  %v2465_v16 = vld [vmem:[#allocation6 + $0x2e0] sm:$0xf] }
  0xf3   : > { %v786_v41 = vld [vmem:[#allocation2 + $0x8] sm:$0xf]  ;;  %1118 = vmatmul.bf16.vlgmr.msra.gmra.mxu1 %v3177_v32  ;;  %1131 = vmatmul.bf16.vlgmr.msra.gmra.mxu2 %v896_v33  ;;  %v2478_v13 = vor.u32 %v2714_v0, %v2475_v1  ;;  %v2713_v17 = vld [vmem:[#allocation6 + $0x2e4] sm:$0xf0]  ;;  %v2457_v28 = vld [vmem:[#allocation6 + $0x2d0] sm:$0xf] }
  0xf4   : > { %v3180_v42 = vld [vmem:[#allocation2 + $0x14] sm:$0x1]  ;;  %v3182_v43 = vunpack.c.l.b16 %v786_v41  ;;  %1170 = vmatmul.bf16.vlgmr.msrb.gmra.mxu0 %v896_v33  ;;  %1409 = vmatpush.bf16.msra.mxu1 %v2376_v30  ;;  %v2337_v30 = vld [vmem:[#allocation6 + $0xa8] sm:$0xf0]  ;;  %v2638_v41 = vld [vmem:[#allocation6 + $0x94] sm:$0xf] }
  0xf5   : > { %v879_v45 = vunpack.c.l.b16 %v3180_v42  ;;  %1448 = vmatpush.bf16.msra.mxu2 %v2380_v34  ;;  %1785 = vmatpush.bf16.msrb.mxu0 %v2542_v20  ;;  %v2499_v33 = vld [vmem:[#allocation6 + $0x328] sm:$0xf0]  ;;  %v2400_v34 = vor.u32 %v2657_v21, %v2399_v19  ;;  %v2391_v20 = vld [vmem:[#allocation6 + $0x110] sm:$0xf]  ;;  %v2340_v9 = vor.u32 %v2640_v29, %v2337_v30  ;;  %v2712_v19 = vld [vmem:[#allocation6 + $0x2e4] sm:$0xf] }
  0xf6   : > { %v2502_v37 = vor.u32 %v2720_v31, %v2499_v33  ;;  %v2392_v49 = vor.u32 %v2655_v35, %v2391_v20  ;;  %v2467_v21 = vld [vmem:[#allocation6 + $0x2e8] sm:$0xf0]  ;;  %v2711_v29 = vld [vmem:[#allocation6 + $0x2d4] sm:$0xf0]  ;;  %v1526_v40 = vrot.slane %v3198_v18, 1 }
  0xf7   : > { %v882_v23 = vpack.c.b16 %v879_v45, %v3182_v43  ;;  %v2470_v26 = vor.u32 %v2712_v19, %v2467_v21  ;;  %v2710_v30 = vld [vmem:[#allocation6 + $0x2d4] sm:$0xf]  ;;  %v2459_v31 = vld [vmem:[#allocation6 + $0x2d8] sm:$0xf0]  ;;  %v2385_v20 = vld [vmem:[#allocation6 + $0x108] sm:$0xf0] }
  0xf8   : > { %1410 = vmatpush.bf16.msra.mxu1 %v2368_v44  ;;  %v2329_v44 = vld [vmem:[#allocation6 + $0x98] sm:$0xf0]  ;;  %v2462_v35 = vor.u32 %v2710_v30, %v2459_v31  ;;  %v2435_v0 = vld [vmem:[#allocation6 + $0x2a8] sm:$0xf0]  ;;  %v2521_v1 = vld [vmem:[#allocation6 + $0x350] sm:$0xf] }
  0xf9   : > { %v900_v58 = vshll.u32 %v882_v23, 16  ;;  %1449 = vmatpush.bf16.msra.mxu2 %v2372_v46  ;;  %1786 = vmatpush.bf16.msrb.mxu0 %v2534_v48  ;;  %v898_v2 = vshrl.u32 %v882_v23, 16  ;;  %v2718_v46 = vld [vmem:[#allocation6 + $0x314] sm:$0xf]  ;;  %v2491_v48 = vld [vmem:[#allocation6 + $0x318] sm:$0xf0] }
  0xfa   : > { %v2383_v23 = vld [vmem:[#allocation6 + $0x100] sm:$0xf]  ;;  %v2703_v15 = vld [vmem:[#allocation6 + $0x294] sm:$0xf0]  ;;  %v2700_v21 = vld [vmem:[#allocation6 + $0x284] sm:$0xf] }
  0xfb   : > { %v902_v3 = vrot.slane %v900_v58, 1  ;;  %v2494_v58 = vor.u32 %v2718_v46, %v2491_v48  ;;  %v2384_v4 = vor.u32 %v2653_v50, %v2383_v23  ;;  %v1190_v23 = vpack.c.b16 %v3182_v43, %v3182_v43  ;;  %v2529_v50 = vld [vmem:[#allocation6 + $0x360] sm:$0xf] }
  0xfc   : > { %1411 = vmatpush.bf16.msra.mxu1 %v2360_v56  ;;  %v2332_v56 = vor.u32 %v2638_v41, %v2329_v44  ;;  %v2537_v41 = vld [vmem:[#allocation6 + $0x370] sm:$0xf]  ;;  %v2731_v44 = vld [vmem:[#allocation6 + $0x374] sm:$0xf0] }
  0xfd   : > { %v903_v5 = vor.u32 %v902_v3, %v898_v2  ;;  %1450 = vmatpush.bf16.msra.mxu2 %v2364_v61  ;;  %1787 = vmatpush.bf16.msrb.mxu0 %v2526_v62  ;;  %v2409_v61 = vld [vmem:[#allocation6 + $0x138] sm:$0xf0]  ;;  %v2473_v62 = vld [vmem:[#allocation6 + $0x2f0] sm:$0xf]  ;;  %v2716_v2 = vld [vmem:[#allocation6 + $0x304] sm:$0xf] }
  0xfe   : > { %v2483_v3 = vld [vmem:[#allocation6 + $0x308] sm:$0xf0] }
  0xff   : > { %2251 = vmatmul.msk.bf16.vlgmr.msra.gmra.mxu3 %vm1106_vm7, %v903_v5  ;;  %v2486_v14 = vor.u32 %v2716_v2, %v2483_v3  ;;  %v2727_v2 = vld [vmem:[#allocation6 + $0x354] sm:$0xf0] }
 0x100   : > { %1426 = vmatpush.bf16.msra.mxu3 %v2408_v12  ;;  %1412 = vmatpush.bf16.msra.mxu1 %v2352_v6  ;;  %v2320_v12 = vor.u32 %v2637_v53, %v2319_v52  ;;  %v2324_v6 = vor.u32 %v2636_v47, %v2321_v59  ;;  %v2707_v52 = vld [vmem:[#allocation6 + $0x2b4] sm:$0xf0]  ;;  %v2538_v53 = vor.u32 %v2731_v44, %v2537_v41  ;;  %v2443_v47 = vld [vmem:[#allocation6 + $0x2b8] sm:$0xf0]  ;;  %v2481_v41 = vld [vmem:[#allocation6 + $0x300] sm:$0xf] }
 0x101   : > { %1451 = vmatpush.bf16.msra.mxu2 %v2356_v7  ;;  %1788 = vmatpush.bf16.msrb.mxu0 %v2518_v10  ;;  %v2474_v7 = vor.u32 %v2715_v63, %v2473_v62  ;;  %v2656_v10 = vld [vmem:[#allocation6 + $0x124] sm:$0xf]  ;;  %v1475_v44 = vld [vmem:[#allocation2 + $0x8] sm:$0xe] }
 0x102   : > { %v2704_v63 = vld [vmem:[#allocation6 + $0x2a4] sm:$0xf] }
 0x103   : > { %2252 = vmatmul.msk.bf16.vlgmr.msrb.gmra.mxu1 %vm1106_vm7, %v903_v5  ;;  %1404 = vmatmul.bf16.vlgmr.msrb.gmra.mxu2 %v1188_v24  ;;  %v2412_v5 = vor.u32 %v2658_v60, %v2409_v61  ;;  %v2433_v60 = vld [vmem:[#allocation6 + $0x2a0] sm:$0xf]  ;;  %v2705_v61 = vld [vmem:[#allocation6 + $0x2a4] sm:$0xf0]  ;;  %v2438_v43 = vor.u32 %v2704_v63, %v2435_v0 }
 0x104   : > { %1413 = vmatpush.bf16.msra.mxu1 %v2344_v22  ;;  %1443 = vmatmul.bf16.vlgmr.msra.gmra.mxu0 %v1188_v24  ;;  %v2404_v22 = vor.u32 %v2656_v10, %v2401_v11  ;;  %v1189_v24 = vpack.c.b16 %v3166_v51, %v3166_v51  ;;  %v2458_v51 = vor.u32 %v2711_v29, %v2457_v28  ;;  %v2725_v10 = vld [vmem:[#allocation6 + $0x344] sm:$0xf0] }
 0x105   : > { %1452 = vmatpush.bf16.msra.mxu2 %v2348_v57  ;;  %1789 = vmatpush.bf16.msrb.mxu0 %v2510_v25  ;;  %v2654_v57 = vld [vmem:[#allocation6 + $0x114] sm:$0xf]  ;;  %v2393_v25 = vld [vmem:[#allocation6 + $0x118] sm:$0xf0]  ;;  %v2434_v3 = vor.u32 %v2705_v61, %v2433_v60  ;;  %v2553_v61 = vld [vmem:[#allocation6 + $0x390] sm:$0xf] }
 0x106   : > { %1427 = vmatpush.bf16.msra.mxu3 %v2400_v34  ;;  %v2396_v33 = vor.u32 %v2654_v57, %v2393_v25  ;;  %v2652_v34 = vld [vmem:[#allocation6 + $0x104] sm:$0xf]  ;;  %v2738_v57 = vld [vmem:[#allocation6 + $0x3b4] sm:$0xf]  ;;  %v2571_v25 = vld [vmem:[#allocation6 + $0x3b8] sm:$0xf0] }
 0x107   : > { %v2388_v39 = vor.u32 %v2652_v34, %v2385_v20  ;;  %v2574_v31 = vor.u32 %v2738_v57, %v2571_v25  ;;  %v2563_v34 = vld [vmem:[#allocation6 + $0x3a8] sm:$0xf0] }
 0x108   : > { %1414 = vmatpush.bf16.msra.mxu1 %v2336_v36  ;;  %v2449_v36 = vld [vmem:[#allocation6 + $0x2c0] sm:$0xf] }
 0x109   : > { %1453 = vmatpush.bf16.msra.mxu2 %v2340_v9  ;;  %1790 = vmatpush.bf16.msrb.mxu0 %v2502_v37  ;;  %v2709_v9 = vld [vmem:[#allocation6 + $0x2c4] sm:$0xf0]  ;;  %v2708_v37 = vld [vmem:[#allocation6 + $0x2c4] sm:$0xf] }
 0x10a   : > { %1428 = vmatpush.bf16.msra.mxu3 %v2392_v49  ;;  %v2450_v46 = vor.u32 %v2709_v9, %v2449_v36  ;;  %v2454_v48 = vor.u32 %v2708_v37, %v2451_v38  ;;  %v2441_v49 = vld [vmem:[#allocation6 + $0x2b0] sm:$0xf]  ;;  %v2555_v37 = vld [vmem:[#allocation6 + $0x398] sm:$0xf0] }
 0x10b   : > { %v2489_v9 = vld [vmem:[#allocation6 + $0x310] sm:$0xf] }
 0x10c   : > { %1415 = vmatpush.bf16.msra.mxu1 %v2328_v55  ;;  %v2706_v55 = vld [vmem:[#allocation6 + $0x2b4] sm:$0xf]  ;;  %v2490_v38 = vor.u32 %v2719_v8, %v2489_v9 }
 0x10d   : > { %1454 = vmatpush.bf16.msra.mxu2 %v2332_v56  ;;  %1791 = vmatpush.bf16.msrb.mxu0 %v2494_v58  ;;  %v2729_v56 = vld [vmem:[#allocation6 + $0x364] sm:$0xf0]  ;;  %v2442_v58 = vor.u32 %v2707_v52, %v2441_v49  ;;  %v2446_v59 = vor.u32 %v2706_v55, %v2443_v47  ;;  %v2547_v49 = vld [vmem:[#allocation6 + $0x388] sm:$0xf0]  ;;  %v2569_v52 = vld [vmem:[#allocation6 + $0x3b0] sm:$0xf]  ;;  %v1521_v55 = vunpack.c.l.b16 %v1475_v44 }
 0x10e   : > { %1429 = vmatpush.bf16.msra.mxu3 %v2384_v4  ;;  %v2530_v62 = vor.u32 %v2729_v56, %v2529_v50  ;;  %v2425_v4 = vld [vmem:[#allocation6 + $0x290] sm:$0xf]  ;;  %v2561_v56 = vld [vmem:[#allocation6 + $0x3a0] sm:$0xf] }
 0x10f   : > { %1157 = vmatmul.bf16.vlgmr.msrb.gmra.mxu3 %v3177_v32  ;;  %v2466_v32 = vor.u32 %v2713_v17, %v2465_v16  ;;  %v2426_v11 = vor.u32 %v2703_v15, %v2425_v4  ;;  %v2701_v16 = vld [vmem:[#allocation6 + $0x284] sm:$0xf0]  ;;  %v1519_v17 = vunpack.c.l.b16 %v3192_v54 }
 0x110   : > { %1416 = vmatpush.bf16.msra.mxu1 %v2320_v12  ;;  %v2522_v12 = vor.u32 %v2727_v2, %v2521_v1  ;;  %v2721_v54 = vld [vmem:[#allocation6 + $0x324] sm:$0xf0]  ;;  %v2545_v1 = vld [vmem:[#allocation6 + $0x380] sm:$0xf] }
 0x111   : > { %1455 = vmatpush.bf16.msra.mxu2 %v2324_v6  ;;  %1792 = vmatpush.bf16.msrb.mxu0 %v2486_v14  ;;  %v2427_v6 = vld [vmem:[#allocation6 + $0x298] sm:$0xf0]  ;;  %v2417_v14 = vld [vmem:[#allocation6 + $0x280] sm:$0xf]  ;;  %v1522_v29 = vpack.c.b16 %v877_v27, %v1519_v17  ;;  %v2734_v27 = vld [vmem:[#allocation6 + $0x394] sm:$0xf] }
 0x112   : > { %1465 = vmatpush.bf16.msrb.mxu3 %v2412_v5  ;;  %v2702_v5 = vld [vmem:[#allocation6 + $0x294] sm:$0xf]  ;;  %v2733_v2 = vld [vmem:[#allocation6 + $0x384] sm:$0xf0] }
 0x113   : > { %1417 = vmatmul.bf16.vlgmr.msra.gmra.mxu1 %v1189_v24  ;;  %v1525_v20 = vrot.slane %v1522_v29, 1 }
 0x114   : > { %1733 = vmatpush.bf16.msrb.mxu1 %v2474_v7  ;;  %1456 = vmatmul.bf16.vlgmr.msra.gmra.mxu2 %v1189_v24  ;;  %v2513_v7 = vld [vmem:[#allocation6 + $0x340] sm:$0xf]  ;;  %v2505_v24 = vld [vmem:[#allocation6 + $0x330] sm:$0xf] }
 0x115   : > { %1772 = vmatpush.bf16.msrb.mxu2 %v2478_v13  ;;  %1793 = vmatmul.bf16.vlgmr.msrb.gmra.mxu0 %v1526_v40  ;;  %v2430_v13 = vor.u32 %v2702_v5, %v2427_v6  ;;  %v2514_v19 = vor.u32 %v2725_v10, %v2513_v7 }
 0x116   : > { %1466 = vmatpush.bf16.msrb.mxu3 %v2404_v22  ;;  %v2419_v22 = vld [vmem:[#allocation6 + $0x288] sm:$0xf0] }
 0x117   : > { %v2422_v28 = vor.u32 %v2700_v21, %v2419_v22 }
 0x118   : > { %1734 = vmatpush.bf16.msrb.mxu1 %v2466_v32  ;;  %v2723_v32 = vld [vmem:[#allocation6 + $0x334] sm:$0xf0] }
 0x119   : > { %1773 = vmatpush.bf16.msrb.mxu2 %v2470_v26  ;;  %v2418_v26 = vor.u32 %v2701_v16, %v2417_v14  ;;  %v2506_v30 = vor.u32 %v2723_v32, %v2505_v24 }
 0x11a   : > { %1467 = vmatpush.bf16.msrb.mxu3 %v2396_v33  ;;  %v2497_v33 = vld [vmem:[#allocation6 + $0x320] sm:$0xf] }
 0x11c   : > { %1735 = vmatpush.bf16.msrb.mxu1 %v2458_v51  ;;  %v2736_v51 = vld [vmem:[#allocation6 + $0x3a4] sm:$0xf] }
 0x11d   : > { %1774 = vmatpush.bf16.msrb.mxu2 %v2462_v35  ;;  %v2498_v35 = vor.u32 %v2721_v54, %v2497_v33  ;;  %v2566_v36 = vor.u32 %v2736_v51, %v2563_v34 }
 0x11e   : > { %1468 = vmatpush.bf16.msrb.mxu3 %v2388_v39  ;;  %v2558_v39 = vor.u32 %v2734_v27, %v2555_v37 }
 0x11f   : > { %2413 = vmatmul.msk.bf16.vlgmr.msra.gmra.mxu3 %vm1106_vm7, %v1190_v23 }
 0x120   : > { %1736 = vmatpush.bf16.msrb.mxu1 %v2450_v46  ;;  %v2717_v46 = vld [vmem:[#allocation6 + $0x304] sm:$0xf0] }
 0x121   : > { %1775 = vmatpush.bf16.msrb.mxu2 %v2454_v48  ;;  %v2732_v48 = vld [vmem:[#allocation6 + $0x384] sm:$0xf]  ;;  %v2482_v47 = vor.u32 %v2717_v46, %v2481_v41 }
 0x122   : > { %1746 = vmatpush.bf16.msra.mxu3 %v2538_v53  ;;  %v2739_v53 = vld [vmem:[#allocation6 + $0x3b4] sm:$0xf0] }
 0x123   : > { %v2570_v50 = vor.u32 %v2739_v53, %v2569_v52 }
 0x124   : > { %1737 = vmatpush.bf16.msrb.mxu1 %v2442_v58  ;;  %v2737_v58 = vld [vmem:[#allocation6 + $0x3a4] sm:$0xf0] }
 0x125   : > { %1776 = vmatpush.bf16.msrb.mxu2 %v2446_v59  ;;  %v1524_v59 = vpack.c.b16 %v879_v45, %v1521_v55  ;;  %v2562_v60 = vor.u32 %v2737_v58, %v2561_v56 }
 0x126   : > { %1747 = vmatpush.bf16.msra.mxu3 %v2530_v62  ;;  %v2735_v62 = vld [vmem:[#allocation6 + $0x394] sm:$0xf0] }
 0x127   : > { %v1527_v63 = vrot.slane %v1524_v59, 1  ;;  %v2554_v0 = vor.u32 %v2735_v62, %v2553_v61 }
 0x128   : > { %1738 = vmatpush.bf16.msrb.mxu1 %v2434_v3  ;;  %v2546_v3 = vor.u32 %v2733_v2, %v2545_v1 }
 0x129   : > { %1777 = vmatpush.bf16.msrb.mxu2 %v2438_v43 }
 0x12a   : > { %1748 = vmatpush.bf16.msra.mxu3 %v2522_v12 }
 0x12c   : > { %1739 = vmatpush.bf16.msrb.mxu1 %v2426_v11 }
 0x12d   : > { %1778 = vmatpush.bf16.msrb.mxu2 %v2430_v13 }
 0x12e   : > { %1749 = vmatpush.bf16.msra.mxu3 %v2514_v19 }
 0x12f   : > { %2414 = vmatmul.msk.bf16.vlgmr.msrb.gmra.mxu3 %vm1106_vm7, %v1190_v23  ;;  %v2550_v23 = vor.u32 %v2732_v48, %v2547_v49 }
 0x130   : > { %1740 = vmatpush.bf16.msrb.mxu1 %v2418_v26 }
 0x131   : > { %1779 = vmatpush.bf16.msrb.mxu2 %v2422_v28 }
 0x132   : > { %1750 = vmatpush.bf16.msra.mxu3 %v2506_v30 }
 0x133   : > { %1741 = vmatmul.bf16.vlgmr.msrb.gmra.mxu1 %v1525_v20 }
 0x134   : > { %1802 = vmatpush.bf16.msra.mxu1 %v2574_v31  ;;  %1780 = vmatmul.bf16.vlgmr.msrb.gmra.mxu2 %v1525_v20 }
 0x136   : > { %1751 = vmatpush.bf16.msra.mxu3 %v2498_v35 }
 0x138   : > { %1803 = vmatpush.bf16.msra.mxu1 %v2566_v36  ;;  %v1813_v36 = vld [vmem:[%s3261_s4] sm:$0x3] }
 0x139   : > { %v1816_v41 = vperm.slane %v1813_v36, 1  ;;  %v1815_v58 = vperm.slane %v1813_v36, 0 }
 0x13a   : > { %1752 = vmatpush.bf16.msra.mxu3 %v2490_v38 }
 0x13c   : > { %1804 = vmatpush.bf16.msra.mxu1 %v2558_v39 }
 0x13e   : > { %1753 = vmatpush.bf16.msra.mxu3 %v2482_v47 }
 0x140   : > { %1805 = vmatpush.bf16.msra.mxu1 %v2550_v23 }
 0x141   : > { %1754 = vmatmul.bf16.vlgmr.msra.gmra.mxu3 %v1526_v40 }
 0x142   : > { %1763 = vmatpush.bf16.msrb.mxu3 %v2570_v50 }
 0x143   : > { %2576 = vmatmul.msk.bf16.vlgmr.msra.gmra.mxu1 %vm1106_vm7, %v1527_v63 }
 0x146   : > { %1764 = vmatpush.bf16.msrb.mxu3 %v2562_v60 }
 0x14a   : > { %1765 = vmatpush.bf16.msrb.mxu3 %v2554_v0 }
 0x14e   : > { %1766 = vmatpush.bf16.msrb.mxu3 %v2546_v3 }
 0x151   : > { %2575 = vmatmul.msk.bf16.vlgmr.msrb.gmra.mxu3 %vm1106_vm7, %v1527_v63 }
 0x170   : > { %v1119_v42 = vpop.f32.mrf.mxu1 }
 0x171   : > { %v1171_v45 = vpop.f32.mrf.mxu0 }
 0x176   : > { %v1132_v43 = vpop.f32.mrf.mxu2 }
 0x177   : > { %v1133_v4 = vadd.f32 %v1132_v43, %v1119_v42 }
 0x178   : > { %v1121_v15 = vpop.f32.mrf.mxu1 }
 0x179   : > { %v1173_v12 = vpop.f32.mrf.mxu0 }
 0x17e   : > { %v1134_v18 = vpop.f32.mrf.mxu2 }
 0x180   : > { %v1184_v40 = vpop.f32.mrf.mxu1 }
 0x181   : > { %v1444_v5 = vpop.f32.mrf.mxu0 }
 0x182   : > { %v1145_v6 = vpop.f32.mrf.mxu3 }
 0x183   : > { %v1146_v7 = vadd.f32 %v1145_v6, %v1133_v4 }
 0x186   : > { %v1405_v10 = vpop.f32.mrf.mxu2 }
 0x187   : > { %v1406_v11 = vadd.f32 %v1405_v10, %v1146_v7 }
 0x188   : > { %v1186_v13 = vpop.f32.mrf.mxu1 }
 0x189   : > { %v1446_v14 = vpop.f32.mrf.mxu0 }
 0x18a   : > { %v1147_v16 = vpop.f32.mrf.mxu3 }
 0x18e   : > { %v1407_v17 = vpop.f32.mrf.mxu2 }
 0x190   : > { %v1418_v19 = vpop.f32.mrf.mxu1 }
 0x191   : > { %v1419_v55 = vadd.f32 %v1418_v19, %v1406_v11 }
 0x192   : > { %v1158_v21 = vpop.f32.mrf.mxu3  ;;  %v1794_v22 = vpop.f32.mrf.mxu0 }
 0x193   : > { %v1172_v31 = vadd.f32 %v1171_v45, %v1158_v21 }
 0x195   : > { %v1185_v54 = vadd.f32 %v1184_v40, %v1172_v31 }
 0x197   : > { %v1457_v24 = vpop.f32.mrf.mxu2  ;;  %v1445_v20 = vadd.f32 %v1444_v5, %v1185_v54 }
 0x198   : > { %v1420_v32 = vpop.f32.mrf.mxu1 }
 0x199   : > { %v1458_v9 = vadd.f32 %v1457_v24, %v1445_v20 }
 0x19a   : > { %v1160_v57 = vpop.f32.mrf.mxu3  ;;  %v1796_v25 = vpop.f32.mrf.mxu0 }
 0x19f   : > { %v1459_v26 = vpop.f32.mrf.mxu2 }
 0x1a2   : > { %v1431_v28 = vpop.f32.mrf.mxu3 }
 0x1a3   : > { %v1432_v50 = vadd.f32 %v1431_v28, %v1419_v55 }
 0x1aa   : > { %v1433_v29 = vpop.f32.mrf.mxu3 }
 0x1b0   : > { %v1742_v30 = vpop.f32.mrf.mxu1 }
 0x1b2   : > { %v1470_v33 = vpop.f32.mrf.mxu3 }
 0x1b3   : > { %v1471_v38 = vadd.f32 %v1470_v33, %v1458_v9 }
 0x1b7   : > { %v1781_v51 = vpop.f32.mrf.mxu2 }
 0x1b8   : > { %v1744_v34 = vpop.f32.mrf.mxu1  ;;  %v1795_v8 = vadd.f32 %v1794_v22, %v1781_v51 }
 0x1ba   : > { %v1472_v35 = vpop.f32.mrf.mxu3 }
 0x1bf   : > { %v1783_v27 = vpop.f32.mrf.mxu2 }
 0x1c0   : > { %v1807_v37 = vpop.f32.mrf.mxu1 }
 0x1c1   : > { %v1808_v39 = vadd.f32 %v1807_v37, %v1795_v8 }
 0x1c3   : > { %v1812_v44 = vadd.f32 %v1808_v39, %v1471_v38 }
 0x1c4   : > { %v1755_v46 = vpop.f32.mrf.mxu3 }
 0x1c5   : > { %v1820_v48 = vadd.f32 %v1816_v41, %v1812_v44  ;;  %v1756_v47 = vadd.f32 %v1755_v46, %v1742_v30 }
 0x1c7   : > { %v1822_v49 = vmax.f32 %v1820_v48, 0.0 }
 0x1c8   : > { %v1809_v52 = vpop.f32.mrf.mxu1 }
 0x1c9   : > { %1824 = vst [vmem:[%s251_s15 + $0x8] sm:$0xff] %v1822_v49 }
 0x1cc   : > { %v1757_v53 = vpop.f32.mrf.mxu3 }
 0x1d4   : > { %v1768_v23 = vpop.f32.mrf.mxu3 }
 0x1d5   : > { %v1769_v56 = vadd.f32 %v1768_v23, %v1756_v47 }
 0x1d7   : > { %v1811_v59 = vadd.f32 %v1769_v56, %v1432_v50 }
 0x1d9   : > { %v1819_v60 = vadd.f32 %v1815_v58, %v1811_v59 }
 0x1db   : > { %v1821_v61 = vmax.f32 %v1819_v60, 0.0 }
 0x1dc   : > { %v1770_v62 = vpop.f32.mrf.mxu3 }
 0x1dd   : > { %1823 = vst [vmem:[%s251_s15] sm:$0xff] %v1821_v61 }
 0x1de   : > { %2892 = shalt.err (!%p2889_p8)
}
 0x1df   : > { %2749 = dma.vmem_to_hbm [thread:$0]  (%p3011_p5), %s1840_s26, 256, %s1842_s30, %s1826_s22  }
 0x1e0 PF: > { %p2766_p9 = scmp.ge.s32.totalorder %s2935_s21, 2  ;;  %s1853_s13 = sand.u32 1, %s2923_s18  }
 0x1e1   : > { %s1854_s14 = scalar_lea.sflag [#allocation5], %s1853_s13 }
 0x1e2   : > { %p2759_p10 = pnand %p2766_p9, %p3015_p6 }
 0x1e4   : > { %p2760_p11 = pneg %p2759_p10 }
 0x1e6   : > { %2918 = dma.done.wait (%p2760_p11), %s1854_s14, 256  }
 0x1e7   : > { %2920 = vsyncadd (%p2760_p11), %s1854_s14, 4294967040  ;;  %p17_p12 = scmp.ge.s32.totalorder %s2998_s24, 4   ;;  %s3278_s18 = smov %s2927_s19 }
 0x1e8   : > { %s3279_s19 = smov %s2931_s20  ;;  %s3280_s20 = smov %s3009_s27 }
 0x1e9   : > { %s3281_s21 = smov %s2998_s24  ;;  %19 = sbr.rel (!%p17_p12) target bundleno = 5 (0x5), region = 88 }
 0x1ee   :  { %1860 = vsyncpa [#allocation4], 1 }
 0x1ef   :  { %1862 = vsyncpa [#allocation4 + $0x1], 1 }
 0x1f0   :  { %1863 = vsyncpa [#allocation7], 1 }
 0x1f1   :  { %1864 = vsyncpa [#allocation5], 1 }
 0x1f2   :  { %1866 = vsyncpa [#allocation5 + $0x1], 1 }

</bundles_post_ra>
